<compile_context>
chip_gen: v5e
topology: v5e:2x2
jax: 0.10.0
libtpu: 0.0.40
codegen_flags: <defaults>
</compile_context>

<pallas_src>
import jax
import jax.numpy as jnp
from jax.experimental import pallas as pl
from jax.experimental.pallas import tpu as pltpu


def _round_up(x, m):
    return (x + m - 1) // m * m


# --------------------------------------------------------------------------
# One-time parameter preparation (hoisted out of the per-step forward).
# --------------------------------------------------------------------------
def prepare_params(params, in_dim, hidden_dim, out_dim, weight_dtype=jnp.bfloat16):
    H = hidden_dim
    IN_P = _round_up(in_dim, 128)
    H_P = _round_up(H, 128)
    OUT_P = _round_up(out_dim, 128)
    K = IN_P + 2 * H_P

    w_ih = params["w_ih"].astype(jnp.float32)                     # (4H, in_dim + H)
    w_hh = params["w_hh"].astype(jnp.float32)                     # (4H, H)
    bias = (params["b_ih"] + params["b_hh"]).astype(jnp.float32)  # (4H,)

    w_attn = w_ih[:, :in_dim]   # (4H, in_dim)
    w_h1 = w_ih[:, in_dim:]     # (4H, H)

    # Merged, transposed, padded gate weight: rows = [attn | h1 | h2] segments,
    # cols = 4 gate blocks of H_P lanes each (i, f, g, o -- PyTorch order).
    # Padded rows/cols and padded bias lanes are zero, which keeps the padded
    # hidden lanes exactly inert (c_pad, h_pad stay 0 given zero-padded state).
    w_gates = jnp.zeros((K, 4 * H_P), jnp.float32)
    b_gates = jnp.zeros((1, 4 * H_P), jnp.float32)
    for gi in range(4):
        rows = slice(gi * H, (gi + 1) * H)
        col = gi * H_P
        w_gates = w_gates.at[0:in_dim, col:col + H].set(w_attn[rows].T)
        w_gates = w_gates.at[IN_P:IN_P + H, col:col + H].set(w_h1[rows].T)
        w_gates = w_gates.at[IN_P + H_P:IN_P + H_P + H, col:col + H].set(w_hh[rows].T)
        b_gates = b_gates.at[0, col:col + H].set(bias[rows])

    # weight_norm(Linear) with default dim=0: w = g * v / ||v|| (row-wise L2).
    v = params["fc_v"].astype(jnp.float32)      # (out_dim, H)
    g = params["fc_g"].astype(jnp.float32)      # (out_dim, 1)
    fc_w = g * v / jnp.linalg.norm(v, axis=1, keepdims=True)
    w_fc = jnp.zeros((H_P, OUT_P), jnp.float32).at[0:H, 0:out_dim].set(fc_w.T)
    b_fc = jnp.zeros((1, OUT_P), jnp.float32).at[0, 0:out_dim].set(
        params["fc_b"].astype(jnp.float32))

    return {
        "w_gates": w_gates.astype(weight_dtype),   # (K, 4*H_P) bf16
        "b_gates": b_gates,                        # (1, 4*H_P) f32
        "w_fc": w_fc.astype(weight_dtype),         # (H_P, OUT_P) bf16
        "b_fc": b_fc,                              # (1, OUT_P) f32
        "dims": (int(in_dim), int(H), int(out_dim), IN_P, H_P, OUT_P),
    }


# --------------------------------------------------------------------------
# Kernel: one grid step == one decode step; weights & state resident in VMEM.
# --------------------------------------------------------------------------
def _language_decoder_kernel(
    attn_ref,     # (Bp, INp)        weighted attention for step t
    h1_ref,       # (Bp, Hp)         td_hidden h for step t
    h2_ref,       # (Bp, Hp)         initial lm hidden
    c2_ref,       # (Bp, Hp)         initial lm cell
    w_gates_ref,  # (INp+2Hp, 4Hp)   merged [W_ih | W_hh]^T (bf16, loaded once)
    b_gates_ref,  # (1, 4Hp)         b_ih + b_hh
    w_fc_ref,     # (Hp, OUTp)       weight-normed fc weight^T (bf16, loaded once)
    b_fc_ref,     # (1, OUTp)        fc bias
    pred_ref,     # (Bp, OUTp)       out: predictions for step t
    h2o_ref,      # (Bp, Hp)         out: final lm hidden
    c2o_ref,      # (Bp, Hp)         out: final lm cell
    xcat_ref,     # VMEM (Bp, INp+2Hp) f32  concat scratch
    h_state,      # VMEM (Bp, Hp) f32       resident hidden state
    c_state,      # VMEM (Bp, Hp) f32       resident cell state
):
    t = pl.program_id(0)
    IN_P = attn_ref.shape[-1]
    H_P = h1_ref.shape[-1]

    @pl.when(t == 0)
    def _():
        h_state[...] = h2_ref[...]
        c_state[...] = c2_ref[...]

    # Assemble [weighted_attn, h1, h2] with lane-aligned slice stores:
    # a single MXU contraction computes all four gates.
    xcat_ref[:, 0:IN_P] = attn_ref[...]
    xcat_ref[:, IN_P:IN_P + H_P] = h1_ref[...]
    xcat_ref[:, IN_P + H_P:IN_P + 2 * H_P] = h_state[...]

    gates = jnp.dot(
        xcat_ref[...].astype(w_gates_ref.dtype), w_gates_ref[...],
        preferred_element_type=jnp.float32,
    ) + b_gates_ref[...]

    # Each gate block occupies H_P (=128-multiple) lanes -> dense slices.
    i_g = jax.nn.sigmoid(gates[:, 0 * H_P:1 * H_P])
    f_g = jax.nn.sigmoid(gates[:, 1 * H_P:2 * H_P])
    g_g = jnp.tanh(gates[:, 2 * H_P:3 * H_P])
    o_g = jax.nn.sigmoid(gates[:, 3 * H_P:4 * H_P])

    c_new = f_g * c_state[...] + i_g * g_g      # all f32 (VPU/EUP)
    h_new = o_g * jnp.tanh(c_new)
    h_state[...] = h_new
    c_state[...] = c_new

    # fc(dropout(h2)) -- dropout is identity in eval mode.
    pred_ref[...] = (
        jnp.dot(h_new.astype(w_fc_ref.dtype), w_fc_ref[...],
                preferred_element_type=jnp.float32)
        + b_fc_ref[...]
    ).astype(pred_ref.dtype)

    # Final-state outputs use a constant block index: only flushed to HBM once
    # at the end of the grid.
    h2o_ref[...] = h_new.astype(h2o_ref.dtype)
    c2o_ref[...] = c_new.astype(c2o_ref.dtype)


# --------------------------------------------------------------------------
# Wrappers
# --------------------------------------------------------------------------
def language_decoder_decode(attn_seq, h1_seq, h2, c2, prep):
    """Run T LanguageDecoder.forward steps in a single pallas_call.

    attn_seq: (T, B, in_dim), h1_seq: (T, B, H), h2/c2: (B, H).
    Returns (preds (T, B, out_dim), (h2_new, c2_new)).
    """
    in_dim, H, out_dim, IN_P, H_P, OUT_P = prep["dims"]
    T, B, _ = attn_seq.shape
    B_P = _round_up(B, 8)
    K = IN_P + 2 * H_P
    f32 = jnp.float32

    attn_p = jnp.pad(attn_seq.astype(f32), ((0, 0), (0, B_P - B), (0, IN_P - in_dim)))
    h1_p = jnp.pad(h1_seq.astype(f32), ((0, 0), (0, B_P - B), (0, H_P - H)))
    h2_p = jnp.pad(h2.astype(f32), ((0, B_P - B), (0, H_P - H)))
    c2_p = jnp.pad(c2.astype(f32), ((0, B_P - B), (0, H_P - H)))

    const2d = lambda shape: pl.BlockSpec(shape, lambda t: (0, 0))
    step3d = lambda shape: pl.BlockSpec((None,) + shape, lambda t: (t, 0, 0))

    cost = pl.CostEstimate(
        flops=int(T * (2 * B_P * K * 4 * H_P + 2 * B_P * H_P * OUT_P)),
        transcendentals=int(T * B_P * H_P * 5),
        bytes_accessed=int(
            2 * (K * 4 * H_P + H_P * OUT_P)          # bf16 weights (loaded once)
            + 4 * (4 * H_P + OUT_P)                  # biases
            + 4 * T * B_P * (IN_P + H_P + OUT_P)     # per-step activations
            + 4 * 4 * B_P * H_P                      # state in/out
        ),
    )

    preds_p, h2n_p, c2n_p = pl.pallas_call(
        _language_decoder_kernel,
        out_shape=(
            jax.ShapeDtypeStruct((T, B_P, OUT_P), jnp.float32),
            jax.ShapeDtypeStruct((B_P, H_P), jnp.float32),
            jax.ShapeDtypeStruct((B_P, H_P), jnp.float32),
        ),
        grid_spec=pltpu.PrefetchScalarGridSpec(
            num_scalar_prefetch=0,
            grid=(T,),
            in_specs=[
                step3d((B_P, IN_P)),        # weighted_attn[t]
                step3d((B_P, H_P)),         # h1[t]
                const2d((B_P, H_P)),        # h2 init
                const2d((B_P, H_P)),        # c2 init
                const2d((K, 4 * H_P)),      # merged gate weights (resident)
                const2d((1, 4 * H_P)),      # gate bias
                const2d((H_P, OUT_P)),      # fc weight (resident)
                const2d((1, OUT_P)),        # fc bias
            ],
            out_specs=(
                step3d((B_P, OUT_P)),       # per-step predictions
                const2d((B_P, H_P)),        # final h2
                const2d((B_P, H_P)),        # final c2
            ),
            scratch_shapes=[
                pltpu.VMEM((B_P, K), jnp.float32),
                pltpu.VMEM((B_P, H_P), jnp.float32),
                pltpu.VMEM((B_P, H_P), jnp.float32),
            ],
        ),
        compiler_params=pltpu.CompilerParams(
            dimension_semantics=("arbitrary",),   # sequential: state carry over t
        ),
        cost_estimate=cost,
    )(attn_p, h1_p, h2_p, c2_p,
      prep["w_gates"], prep["b_gates"], prep["w_fc"], prep["b_fc"])

    preds = preds_p[:, :B, :out_dim]
    return preds, (h2n_p[:B, :H], c2n_p[:B, :H])


def language_decoder_forward(weighted_attn, h1, h2, c2, prep):
    """Single-step, module-equivalent forward: preds, (h2_new, c2_new)."""
    preds, state = language_decoder_decode(weighted_attn[None], h1[None], h2, c2, prep)
    return preds[0], state


# --------------------------------------------------------------------------
# Parameter init (mirrors the PyTorch module) and pure-JAX references.
# --------------------------------------------------------------------------
def init_params(key, in_dim, out_dim, hidden_dim, fc_bias_init):
    H = hidden_dim
    k_ih, k_hh, k_bih, k_bhh, k_fc = jax.random.split(key, 5)
    bound = 1.0 / jnp.sqrt(H)  # PyTorch LSTMCell default init range
    params = {
        "w_ih": jax.random.uniform(k_ih, (4 * H, in_dim + H), jnp.float32, -bound, bound),
        "w_hh": jax.random.uniform(k_hh, (4 * H, H), jnp.float32, -bound, bound),
        "b_ih": jax.random.uniform(k_bih, (4 * H,), jnp.float32, -bound, bound),
        "b_hh": jax.random.uniform(k_bhh, (4 * H,), jnp.float32, -bound, bound),
    }
    fc_v = jax.random.uniform(k_fc, (out_dim, H), jnp.float32, -0.1, 0.1)
    params["fc_v"] = fc_v
    params["fc_g"] = jnp.linalg.norm(fc_v, axis=1, keepdims=True)     # (out_dim, 1)
    params["fc_b"] = jnp.full((out_dim,), fc_bias_init, jnp.float32)  # bias.fill_()
    return params


def _reference_decode_f32(attn_seq, h1_seq, h2, c2, params):
    """Pure f32 PyTorch-equivalent math, applied step by step."""
    v = params["fc_v"]
    fc_w = params["fc_g"] * v / jnp.linalg.norm(v, axis=1, keepdims=True)
    preds = []
    for t in range(attn_seq.shape[0]):
        x = jnp.concatenate([attn_seq[t], h1_seq[t]], axis=1)
        gates = (x @ params["w_ih"].T + params["b_ih"]
                 + h2 @ params["w_hh"].T + params["b_hh"])
        i, f, g, o = jnp.split(gates, 4, axis=1)
        c2 = jax.nn.sigmoid(f) * c2 + jax.nn.sigmoid(i) * jnp.tanh(g)
        h2 = jax.nn.sigmoid(o) * jnp.tanh(c2)
        preds.append(h2 @ fc_w.T + params["fc_b"])
    return jnp.stack(preds), (h2, c2)


def _reference_decode_prepared(attn_seq, h1_seq, h2, c2, prep):
    """Same math as the kernel (bf16 weights, f32 accumulation/state)."""
    in_dim, H, out_dim, IN_P, H_P, OUT_P = prep["dims"]
    T, B, _ = attn_seq.shape
    B_P = _round_up(B, 8)
    w_g, b_g = prep["w_gates"], prep["b_gates"]
    w_fc, b_fc = prep["w_fc"], prep["b_fc"]
    attn_p = jnp.pad(attn_seq, ((0, 0), (0, B_P - B), (0, IN_P - in_dim)))
    h1_p = jnp.pad(h1_seq, ((0, 0), (0, B_P - B), (0, H_P - H)))
    h = jnp.pad(h2, ((0, B_P - B), (0, H_P - H)))
    c = jnp.pad(c2, ((0, B_P - B), (0, H_P - H)))
    preds = []
    for t in range(T):
        x = jnp.concatenate([attn_p[t], h1_p[t], h], axis=1).astype(w_g.dtype)
        gates = jnp.dot(x, w_g, preferred_element_type=jnp.float32) + b_g
        i = jax.nn.sigmoid(gates[:, 0 * H_P:1 * H_P])
        f = jax.nn.sigmoid(gates[:, 1 * H_P:2 * H_P])
        g = jnp.tanh(gates[:, 2 * H_P:3 * H_P])
        o = jax.nn.sigmoid(gates[:, 3 * H_P:4 * H_P])
        c = f * c + i * g
        h = o * jnp.tanh(c)
        preds.append(jnp.dot(h.astype(w_fc.dtype), w_fc,
                             preferred_element_type=jnp.float32) + b_fc)
    preds = jnp.stack(preds)[:, :B, :out_dim]
    return preds, (h[:B, :H], c[:B, :H])


if __name__ == "__main__":
    T, B, in_dim, hidden_dim, out_dim = 8, 2, 32, 32, 64
    fc_bias_init = 0.0

    key = jax.random.PRNGKey(0)
    k_p, k_attn, k_h1, k_h2, k_c2 = jax.random.split(key, 5)

    params = init_params(k_p, in_dim, out_dim, hidden_dim, fc_bias_init)
    prep = prepare_params(params, in_dim, hidden_dim, out_dim)  # one-time weight prep

    attn_seq = jax.random.normal(k_attn, (T, B, in_dim), jnp.float32)
    h1_seq = jax.random.normal(k_h1, (T, B, hidden_dim), jnp.float32)  # td_hidden h per step
    h2 = jax.random.normal(k_h2, (B, hidden_dim), jnp.float32)         # lm_hidden h
    c2 = jax.random.normal(k_c2, (B, hidden_dim), jnp.float32)         # lm_hidden c

    preds, (h2_new, c2_new) = language_decoder_decode(attn_seq, h1_seq, h2, c2, prep)
    jax.block_until_ready((preds, h2_new, c2_new))
    assert preds.shape == (T, B, out_dim)

    # Tight check vs a reference running the exact same (bf16-weight) math.
    p_ref, (h_ref, c_ref) = _reference_decode_prepared(attn_seq, h1_seq, h2, c2, prep)
    assert jnp.allclose(preds, p_ref, atol=2e-3, rtol=2e-3)
    assert jnp.allclose(h2_new, h_ref, atol=2e-3, rtol=2e-3)
    assert jnp.allclose(c2_new, c_ref, atol=2e-3, rtol=2e-3)

    # Semantic check vs pure-f32 PyTorch-equivalent math (difference comes only
    # from bf16 weight quantization).
    p32, (h32, c32) = _reference_decode_f32(attn_seq, h1_seq, h2, c2, params)
    assert jnp.allclose(preds, p32, atol=5e-2, rtol=5e-2)
    assert jnp.allclose(h2_new, h32, atol=5e-2, rtol=5e-2)
    assert jnp.allclose(c2_new, c32, atol=5e-2, rtol=5e-2)

    # Single-step (module-equivalent) API.
    p1, _ = language_decoder_forward(attn_seq[0], h1_seq[0], h2, c2, prep)
    jax.block_until_ready(p1)
    assert jnp.allclose(p1, p32[0], atol=5e-2, rtol=5e-2)

    print("KERNEL_OK")
</pallas_src>

<mosaic_0001>
module attributes {stable_mosaic.version = 11 : i64} {
  func.func @_language_decoder_kernel(%arg0: i32, %arg1: memref<1x8x128xf32, #tpu.memory_space<vmem>>, %arg2: memref<1x8x128xf32, #tpu.memory_space<vmem>>, %arg3: memref<8x128xf32, #tpu.memory_space<vmem>>, %arg4: memref<8x128xf32, #tpu.memory_space<vmem>>, %arg5: memref<384x512xbf16, #tpu.memory_space<vmem>>, %arg6: memref<1x512xf32, #tpu.memory_space<vmem>>, %arg7: memref<128x128xbf16, #tpu.memory_space<vmem>>, %arg8: memref<1x128xf32, #tpu.memory_space<vmem>>, %arg9: memref<1x8x128xf32, #tpu.memory_space<vmem>>, %arg10: memref<8x128xf32, #tpu.memory_space<vmem>>, %arg11: memref<8x128xf32, #tpu.memory_space<vmem>>, %arg12: memref<8x384xf32, #tpu.memory_space<vmem>>, %arg13: memref<8x128xf32, #tpu.memory_space<vmem>>, %arg14: memref<8x128xf32, #tpu.memory_space<vmem>>) attributes {dimension_semantics = [#tpu.dimension_semantics<arbitrary>], iteration_bounds = array<i64: 8>, scalar_prefetch = 0 : i64, scratch_operands = 3 : i64, tpu.core_type = #tpu.core_type<tc>, window_params = [{transform_indices = @transform_0, window_bounds = array<i64: 1, 8, 128>}, {transform_indices = @transform_1, window_bounds = array<i64: 1, 8, 128>}, {pipeline_mode = #tpu.pipeline_mode<synchronous>, transform_indices = @transform_2, window_bounds = array<i64: 8, 128>}, {pipeline_mode = #tpu.pipeline_mode<synchronous>, transform_indices = @transform_3, window_bounds = array<i64: 8, 128>}, {pipeline_mode = #tpu.pipeline_mode<synchronous>, transform_indices = @transform_4, window_bounds = array<i64: 384, 512>}, {pipeline_mode = #tpu.pipeline_mode<synchronous>, transform_indices = @transform_5, window_bounds = array<i64: 1, 512>}, {pipeline_mode = #tpu.pipeline_mode<synchronous>, transform_indices = @transform_6, window_bounds = array<i64: 128, 128>}, {pipeline_mode = #tpu.pipeline_mode<synchronous>, transform_indices = @transform_7, window_bounds = array<i64: 1, 128>}, {transform_indices = @transform_8, window_bounds = array<i64: 1, 8, 128>}, {pipeline_mode = #tpu.pipeline_mode<synchronous>, transform_indices = @transform_9, window_bounds = array<i64: 8, 128>}, {pipeline_mode = #tpu.pipeline_mode<synchronous>, transform_indices = @transform_10, window_bounds = array<i64: 8, 128>}]} {
    %c0_i32 = arith.constant 0 : i32
    %0 = arith.cmpi eq, %arg0, %c0_i32 : i32
    %1 = arith.extui %0 : i1 to i32
    %c0_i32_0 = arith.constant 0 : i32
    %2 = arith.cmpi ne, %1, %c0_i32_0 : i32
    scf.if %2 {
      %c0_39 = arith.constant 0 : index
      %c0_40 = arith.constant 0 : index
      %57 = vector.load %arg3[%c0_39, %c0_40] : memref<8x128xf32, #tpu.memory_space<vmem>>, vector<8x128xf32>
      %c0_41 = arith.constant 0 : index
      %c0_42 = arith.constant 0 : index
      %58 = vector.load %arg13[%c0_41, %c0_42] : memref<8x128xf32, #tpu.memory_space<vmem>>, vector<8x128xf32>
      tpu.vector_store %arg13[%c0_41, %c0_42], %57 {strides = array<i32>} : memref<8x128xf32, #tpu.memory_space<vmem>>, vector<8x128xf32>,
      %c0_43 = arith.constant 0 : index
      %c0_44 = arith.constant 0 : index
      %59 = vector.load %arg4[%c0_43, %c0_44] : memref<8x128xf32, #tpu.memory_space<vmem>>, vector<8x128xf32>
      %c0_45 = arith.constant 0 : index
      %c0_46 = arith.constant 0 : index
      %60 = vector.load %arg14[%c0_45, %c0_46] : memref<8x128xf32, #tpu.memory_space<vmem>>, vector<8x128xf32>
      tpu.vector_store %arg14[%c0_45, %c0_46], %59 {strides = array<i32>} : memref<8x128xf32, #tpu.memory_space<vmem>>, vector<8x128xf32>,
    } else {
    }
    %c0 = arith.constant 0 : index
    %c0_1 = arith.constant 0 : index
    %c0_2 = arith.constant 0 : index
    %3 = vector.load %arg1[%c0, %c0_1, %c0_2] : memref<1x8x128xf32, #tpu.memory_space<vmem>>, vector<1x8x128xf32>
    %4 = vector.shape_cast %3 : vector<1x8x128xf32> to vector<8x128xf32>
    %c0_3 = arith.constant 0 : index
    %c0_4 = arith.constant 0 : index
    %5 = vector.load %arg12[%c0_3, %c0_4] : memref<8x384xf32, #tpu.memory_space<vmem>>, vector<8x128xf32>
    tpu.vector_store %arg12[%c0_3, %c0_4], %4 {strides = array<i32>} : memref<8x384xf32, #tpu.memory_space<vmem>>, vector<8x128xf32>,
    %c0_5 = arith.constant 0 : index
    %c0_6 = arith.constant 0 : index
    %c0_7 = arith.constant 0 : index
    %6 = vector.load %arg2[%c0_5, %c0_6, %c0_7] : memref<1x8x128xf32, #tpu.memory_space<vmem>>, vector<1x8x128xf32>
    %7 = vector.shape_cast %6 : vector<1x8x128xf32> to vector<8x128xf32>
    %c0_8 = arith.constant 0 : index
    %c128 = arith.constant 128 : index
    %8 = vector.load %arg12[%c0_8, %c128] : memref<8x384xf32, #tpu.memory_space<vmem>>, vector<8x128xf32>
    tpu.vector_store %arg12[%c0_8, %c128], %7 {strides = array<i32>} : memref<8x384xf32, #tpu.memory_space<vmem>>, vector<8x128xf32>,
    %c0_9 = arith.constant 0 : index
    %c0_10 = arith.constant 0 : index
    %9 = vector.load %arg13[%c0_9, %c0_10] : memref<8x128xf32, #tpu.memory_space<vmem>>, vector<8x128xf32>
    %c0_11 = arith.constant 0 : index
    %c256 = arith.constant 256 : index
    %10 = vector.load %arg12[%c0_11, %c256] : memref<8x384xf32, #tpu.memory_space<vmem>>, vector<8x128xf32>
    tpu.vector_store %arg12[%c0_11, %c256], %9 {strides = array<i32>} : memref<8x384xf32, #tpu.memory_space<vmem>>, vector<8x128xf32>,
    %c0_12 = arith.constant 0 : index
    %c0_13 = arith.constant 0 : index
    %11 = vector.load %arg12[%c0_12, %c0_13] : memref<8x384xf32, #tpu.memory_space<vmem>>, vector<8x384xf32>
    %12 = arith.truncf %11 : vector<8x384xf32> to vector<8x384xbf16>
    %c0_14 = arith.constant 0 : index
    %c0_15 = arith.constant 0 : index
    %13 = vector.load %arg5[%c0_14, %c0_15] : memref<384x512xbf16, #tpu.memory_space<vmem>>, vector<384x512xbf16>
    %cst = arith.constant dense<0.000000e+00> : vector<8x512xf32>
    %14 = tpu.matmul %12, %13, %cst {dimension_numbers = #tpu.dot_dimension_numbers<[1], [0], [0], [1], [0, 0, 1, 1], [], []>} : vector<8x384xbf16>, vector<384x512xbf16>, vector<8x512xf32> -> vector<8x512xf32>
    %c0_16 = arith.constant 0 : index
    %c0_17 = arith.constant 0 : index
    %15 = vector.load %arg6[%c0_16, %c0_17] : memref<1x512xf32, #tpu.memory_space<vmem>>, vector<1x512xf32>
    %16 = vector.broadcast %15 : vector<1x512xf32> to vector<8x512xf32>
    %17 = arith.addf %14, %16 : vector<8x512xf32>
    %18 = vector.extract_strided_slice %17 {offsets = [0, 0], sizes = [8, 128], strides = [1, 1]} : vector<8x512xf32> to vector<8x128xf32>
    %19 = arith.negf %18 : vector<8x128xf32>
    %20 = math.exp %19 : vector<8x128xf32>
    %cst_18 = arith.constant 1.000000e+00 : f32
    %21 = vector.broadcast %cst_18 : f32 to vector<8x128xf32>
    %22 = arith.addf %21, %20 : vector<8x128xf32>
    %23 = arith.divf %21, %22 : vector<8x128xf32>
    %24 = vector.extract_strided_slice %17 {offsets = [0, 128], sizes = [8, 128], strides = [1, 1]} : vector<8x512xf32> to vector<8x128xf32>
    %25 = arith.negf %24 : vector<8x128xf32>
    %26 = math.exp %25 : vector<8x128xf32>
    %cst_19 = arith.constant 1.000000e+00 : f32
    %27 = vector.broadcast %cst_19 : f32 to vector<8x128xf32>
    %28 = arith.addf %27, %26 : vector<8x128xf32>
    %29 = arith.divf %27, %28 : vector<8x128xf32>
    %30 = vector.extract_strided_slice %17 {offsets = [0, 256], sizes = [8, 128], strides = [1, 1]} : vector<8x512xf32> to vector<8x128xf32>
    %31 = math.tanh %30 : vector<8x128xf32>
    %32 = vector.extract_strided_slice %17 {offsets = [0, 384], sizes = [8, 128], strides = [1, 1]} : vector<8x512xf32> to vector<8x128xf32>
    %33 = arith.negf %32 : vector<8x128xf32>
    %34 = math.exp %33 : vector<8x128xf32>
    %cst_20 = arith.constant 1.000000e+00 : f32
    %35 = vector.broadcast %cst_20 : f32 to vector<8x128xf32>
    %36 = arith.addf %35, %34 : vector<8x128xf32>
    %37 = arith.divf %35, %36 : vector<8x128xf32>
    %c0_21 = arith.constant 0 : index
    %c0_22 = arith.constant 0 : index
    %38 = vector.load %arg14[%c0_21, %c0_22] : memref<8x128xf32, #tpu.memory_space<vmem>>, vector<8x128xf32>
    %39 = arith.mulf %29, %38 : vector<8x128xf32>
    %40 = arith.mulf %23, %31 : vector<8x128xf32>
    %41 = arith.addf %39, %40 : vector<8x128xf32>
    %42 = math.tanh %41 : vector<8x128xf32>
    %43 = arith.mulf %37, %42 : vector<8x128xf32>
    %c0_23 = arith.constant 0 : index
    %c0_24 = arith.constant 0 : index
    %44 = vector.load %arg13[%c0_23, %c0_24] : memref<8x128xf32, #tpu.memory_space<vmem>>, vector<8x128xf32>
    tpu.vector_store %arg13[%c0_23, %c0_24], %43 {strides = array<i32>} : memref<8x128xf32, #tpu.memory_space<vmem>>, vector<8x128xf32>,
    %c0_25 = arith.constant 0 : index
    %c0_26 = arith.constant 0 : index
    %45 = vector.load %arg14[%c0_25, %c0_26] : memref<8x128xf32, #tpu.memory_space<vmem>>, vector<8x128xf32>
    tpu.vector_store %arg14[%c0_25, %c0_26], %41 {strides = array<i32>} : memref<8x128xf32, #tpu.memory_space<vmem>>, vector<8x128xf32>,
    %46 = arith.truncf %43 : vector<8x128xf32> to vector<8x128xbf16>
    %c0_27 = arith.constant 0 : index
    %c0_28 = arith.constant 0 : index
    %47 = vector.load %arg7[%c0_27, %c0_28] : memref<128x128xbf16, #tpu.memory_space<vmem>>, vector<128x128xbf16>
    %cst_29 = arith.constant dense<0.000000e+00> : vector<8x128xf32>
    %48 = tpu.matmul %46, %47, %cst_29 {dimension_numbers = #tpu.dot_dimension_numbers<[1], [0], [0], [1], [0, 0, 1, 1], [], []>} : vector<8x128xbf16>, vector<128x128xbf16>, vector<8x128xf32> -> vector<8x128xf32>
    %c0_30 = arith.constant 0 : index
    %c0_31 = arith.constant 0 : index
    %49 = vector.load %arg8[%c0_30, %c0_31] : memref<1x128xf32, #tpu.memory_space<vmem>>, vector<1x128xf32>
    %50 = vector.broadcast %49 : vector<1x128xf32> to vector<8x128xf32>
    %51 = arith.addf %48, %50 : vector<8x128xf32>
    %c0_32 = arith.constant 0 : index
    %c0_33 = arith.constant 0 : index
    %c0_34 = arith.constant 0 : index
    %52 = vector.load %arg9[%c0_32, %c0_33, %c0_34] : memref<1x8x128xf32, #tpu.memory_space<vmem>>, vector<1x8x128xf32>
    %53 = vector.shape_cast %52 : vector<1x8x128xf32> to vector<8x128xf32>
    %54 = vector.shape_cast %51 : vector<8x128xf32> to vector<1x8x128xf32>
    tpu.vector_store %arg9[%c0_32, %c0_33, %c0_34], %54 {strides = array<i32>} : memref<1x8x128xf32, #tpu.memory_space<vmem>>, vector<1x8x128xf32>,
    %c0_35 = arith.constant 0 : index
    %c0_36 = arith.constant 0 : index
    %55 = vector.load %arg10[%c0_35, %c0_36] : memref<8x128xf32, #tpu.memory_space<vmem>>, vector<8x128xf32>
    tpu.vector_store %arg10[%c0_35, %c0_36], %43 {strides = array<i32>} : memref<8x128xf32, #tpu.memory_space<vmem>>, vector<8x128xf32>,
    %c0_37 = arith.constant 0 : index
    %c0_38 = arith.constant 0 : index
    %56 = vector.load %arg11[%c0_37, %c0_38] : memref<8x128xf32, #tpu.memory_space<vmem>>, vector<8x128xf32>
    tpu.vector_store %arg11[%c0_37, %c0_38], %41 {strides = array<i32>} : memref<8x128xf32, #tpu.memory_space<vmem>>, vector<8x128xf32>,
    return
  }
  func.func @transform_0(%arg0: i32) -> (i32, i32, i32) {
    %c0_i32 = arith.constant 0 : i32
    %c0_i32_0 = arith.constant 0 : i32
    %c0_i32_1 = arith.constant 0 : i32
    return %arg0, %c0_i32, %c0_i32_0 : i32, i32, i32
  }
  func.func @transform_1(%arg0: i32) -> (i32, i32, i32) {
    %c0_i32 = arith.constant 0 : i32
    %c0_i32_0 = arith.constant 0 : i32
    %c0_i32_1 = arith.constant 0 : i32
    return %arg0, %c0_i32, %c0_i32_0 : i32, i32, i32
  }
  func.func @transform_2(%arg0: i32) -> (i32, i32) {
    %c0_i32 = arith.constant 0 : i32
    %c0_i32_0 = arith.constant 0 : i32
    %c0_i32_1 = arith.constant 0 : i32
    return %c0_i32, %c0_i32_0 : i32, i32
  }
  func.func @transform_3(%arg0: i32) -> (i32, i32) {
    %c0_i32 = arith.constant 0 : i32
    %c0_i32_0 = arith.constant 0 : i32
    %c0_i32_1 = arith.constant 0 : i32
    return %c0_i32, %c0_i32_0 : i32, i32
  }
  func.func @transform_4(%arg0: i32) -> (i32, i32) {
    %c0_i32 = arith.constant 0 : i32
    %c0_i32_0 = arith.constant 0 : i32
    %c0_i32_1 = arith.constant 0 : i32
    return %c0_i32, %c0_i32_0 : i32, i32
  }
  func.func @transform_5(%arg0: i32) -> (i32, i32) {
    %c0_i32 = arith.constant 0 : i32
    %c0_i32_0 = arith.constant 0 : i32
    %c0_i32_1 = arith.constant 0 : i32
    return %c0_i32, %c0_i32_0 : i32, i32
  }
  func.func @transform_6(%arg0: i32) -> (i32, i32) {
    %c0_i32 = arith.constant 0 : i32
    %c0_i32_0 = arith.constant 0 : i32
    %c0_i32_1 = arith.constant 0 : i32
    return %c0_i32, %c0_i32_0 : i32, i32
  }
  func.func @transform_7(%arg0: i32) -> (i32, i32) {
    %c0_i32 = arith.constant 0 : i32
    %c0_i32_0 = arith.constant 0 : i32
    %c0_i32_1 = arith.constant 0 : i32
    return %c0_i32, %c0_i32_0 : i32, i32
  }
  func.func @transform_8(%arg0: i32) -> (i32, i32, i32) {
    %c0_i32 = arith.constant 0 : i32
    %c0_i32_0 = arith.constant 0 : i32
    %c0_i32_1 = arith.constant 0 : i32
    return %arg0, %c0_i32, %c0_i32_0 : i32, i32, i32
  }
  func.func @transform_9(%arg0: i32) -> (i32, i32) {
    %c0_i32 = arith.constant 0 : i32
    %c0_i32_0 = arith.constant 0 : i32
    %c0_i32_1 = arith.constant 0 : i32
    return %c0_i32, %c0_i32_0 : i32, i32
  }
  func.func @transform_10(%arg0: i32) -> (i32, i32) {
    %c0_i32 = arith.constant 0 : i32
    %c0_i32_0 = arith.constant 0 : i32
    %c0_i32_1 = arith.constant 0 : i32
    return %c0_i32, %c0_i32_0 : i32, i32
  }
}

</mosaic_0001>

<bundles_post_ra>
// kernel: tpu_custom_call.1
= control target key start
LH: loop header
LB: loop body
LE: loop exit
PB: predicated region body
PF: predicated region fallthrough
CT: control target
= control target key end

     0   :  { %s2913_s0 = inlined_call_operand.hbm [shape: f32[8,8,128], index: 0, kind: input, shape index: {}]   ;;  %s2914_s1 = inlined_call_operand.hbm [shape: f32[8,8,128], index: 1, kind: input, shape index: {}]   ;;  %s2915_s2 = inlined_call_operand.hbm [shape: f32[8,128], index: 2, kind: input, shape index: {}]   ;;  %s2916_s3 = inlined_call_operand.hbm [shape: f32[8,128], index: 3, kind: input, shape index: {}]   ;;  %s2917_s4 = inlined_call_operand.hbm [shape: bf16[384,512], index: 4, kind: input, shape index: {}]   ;;  %s2918_s5 = inlined_call_operand.vmem [shape: f32[1,512], index: 5, kind: input, shape index: {}]   ;;  %s2919_s6 = inlined_call_operand.hbm [shape: bf16[128,128], index: 6, kind: input, shape index: {}]   ;;  %s2920_s7 = inlined_call_operand.vmem [shape: f32[1,128], index: 7, kind: input, shape index: {}]   ;;  %s2921_s8 = inlined_call_operand.hbm [shape: f32[8,8,128], index: 8, kind: output, shape index: {0}]   ;;  %s2922_s9 = inlined_call_operand.hbm [shape: f32[8,128], index: 9, kind: output, shape index: {1}]   ;;  %s2923_s10 = inlined_call_operand.hbm [shape: f32[8,128], index: 10, kind: output, shape index: {2}]  }
   0x1   :  { %2930 = sst [smem:[#allocation32_spill]] %s2915_s2 }
   0x2   :  { %2931 = sst [smem:[#allocation33_spill]] %s2916_s3 }
   0x3   :  { %2932 = sst [smem:[#allocation34_spill]] %s2917_s4 }
   0x4   :  { %2933 = sst [smem:[#allocation35_spill]] %s2919_s6 }
   0x5   :  { %16 = vsyncpa [#allocation6], 0 }
   0x6   :  { %18 = vsyncpa [#allocation6 + $0x1], 0 }
   0x7   :  { %19 = vsyncpa [#allocation9], 0 }
   0x8   :  { %21 = vsyncpa [#allocation9 + $0x1], 0 }
   0x9   :  { %22 = vsyncpa [#allocation12], 0 }
   0xa   :  { %23 = vsyncpa [#allocation15], 0 }
   0xb   :  { %24 = vsyncpa [#allocation7], 0 }
   0xc   :  { %26 = vsyncpa [#allocation7 + $0x1], 0 }
   0xd   :  { %27 = vsyncpa [#allocation18], 0  ;;  %s2648_s13 = smov 0   ;;  %s2650_s14 = smov 0  }
   0xe   :  { %s2652_s15 = smov 0   ;;  %s2654_s16 = smov 0  }
   0xf LB: > { %2934 = sst [smem:[#allocation27_spill]] %s2569_s13  ;;  %s2672_s20 = sadd.s32 4294967295, %s2581_s16   ;;  %s2581_s16 = sphi %s2654_s16, %s2959_s16   ;;  %s2577_s15 = sphi %s2652_s15, %s2961_s15   ;;  %s2573_s14 = sphi %s2650_s14, %s2963_s14   ;;  %s2569_s13 = sphi %s2648_s13, %s2962_s13  }
  0x10   : > { %2935 = sst [smem:[#allocation28_spill]] %s2577_s15  ;;  %p1582_p0 = scmp.ge.s32.totalorder %s2581_s16, 1 }
  0x11   : > { %s2936_s2 = sld [smem:[#allocation32_spill]]  ;;  %p54_p1 = scmp.eq.s32.totalorder %s2672_s20, 0 }
  0x12   : > { %p284_p2 = scmp.lt.s32.totalorder %s2581_s16, 9  ;;  %s2583_s22 = smov [#allocation10]  }
  0x13   : > { %s298_s23 = sshll.u32 %s2583_s22, 4  ;;  %s2938_s3 = sld [smem:[#allocation33_spill]]  ;;  %s299_s23 = int_to_ptr.vmem [resolvable:$true] %s298_s23 }
  0x14   : > { %p2678_p4 = pnand %p1582_p0, %p284_p2  ;;  %s2584_s28 = smov [#allocation11]  }
  0x15   : > { %s310_s29 = sshll.u32 %s2584_s28, 4  ;;  %s2940_s4 = sld [smem:[#allocation34_spill]]  ;;  %s311_s29 = int_to_ptr.vmem [resolvable:$true] %s310_s29 }
  0x16   : > { %p2162_p5 = pneg %p2678_p4  ;;  %s2585_s17 = smov [#allocation13]  }
  0x17   : > { %s296_s19 = sshll.u32 %s2936_s2, 4  ;;  %s321_s18 = sshll.u32 %s2585_s17, 4  ;;  %s297_s19 = int_to_ptr.hbm [resolvable:$true] %s296_s19  ;;  %s322_s18 = int_to_ptr.vmem [resolvable:$true] %s321_s18 }
  0x18   : > { %p2689_p6 = pnand %p2162_p5, %p54_p1  ;;  %s2941_s6 = sld [smem:[#allocation35_spill]] }
  0x19   : > { %s308_s26 = sshll.u32 %s2938_s3, 4  ;;  %s2586_s28 = smov 256   ;;  %s309_s26 = int_to_ptr.hbm [resolvable:$true] %s308_s26 }
  0x1a   : > { %2165 = dma.hbm_to_vmem [thread:$0]  (!%p2689_p6), %s297_s19, 128, %s299_s23, [#allocation9]  }
  0x1b   : > { %s319_s12 = sshll.u32 %s2940_s4, 4  ;;  %s2587_s30 = smov 16   ;;  %s320_s12 = int_to_ptr.hbm [resolvable:$true] %s319_s12 }
  0x1c   : > { %2168 = dma.hbm_to_vmem [thread:$0]  (!%p2689_p6), %s309_s26, 128, %s311_s29, [#allocation12]  }
  0x1d   : > { %2171 = dma.hbm_to_vmem [thread:$0]  (!%p2689_p6), %s320_s12, 12288, %s322_s18, [#allocation12], %s2586_s28, %s2586_s28, %s2587_s30  }
  0x1e   : > { %s336_s25 = sshll.u32 %s2941_s6, 4  ;;  %s2588_s19 = smov [#allocation14]   ;;  %s337_s25 = int_to_ptr.hbm [resolvable:$true] %s336_s25 }
  0x1f   : > { %s338_s23 = sshll.u32 %s2588_s19, 4  ;;  %s2589_s26 = smov 64   ;;  %s339_s23 = int_to_ptr.vmem [resolvable:$true] %s338_s23 }
  0x20   : > { %s2590_s29 = smov 4   ;;  %s1581_s11 = sadd.s32 4294967294, %s2581_s16  }
  0x21   : > { %2174 = dma.hbm_to_vmem [thread:$0]  (!%p2689_p6), %s337_s25, 1024, %s339_s23, [#allocation15], %s2589_s26, %s2589_s26, %s2590_s29  }
  0x22   : > { %s2709_s17 = sadd.s32 1, %s2581_s16   ;;  %s40_s12 = sadd.s32 1, %s2577_s15 }
  0x23   : > { %2942 = sst [smem:[#allocation29_spill]] %s2709_s17  ;;  %s37_s22 = ssub.s32 %s2581_s16, %s2709_s17 }
  0x24   : > { %p38_p7 = scmp.eq.s32.totalorder %s37_s22, 0  ;;  %p47_p8 = scmp.ne.s32.totalorder %s2577_s15, %s2573_s14 }
  0x25   : > { %p48_p9 = scmp.eq.s32.totalorder %s2581_s16, 0  ;;  %p53_p10 = scmp.ne.s32.totalorder %s2573_s14, %s2569_s13 }
  0x26   : > { %s2720_s18 = scalar_select %p38_p7, %s2577_s15, %s40_s12  }
  0x27   : > { %p2722_p11 = por %p48_p9, %p47_p8  ;;  %p2728_p12 = por %p54_p1, %p53_p10 }
  0x28   : > { %2943 = sst [smem:[#allocation30_spill]] %s2720_s18  ;;  %p2927_p13 = scmp.eq.s32.totalorder %s2672_s20, 7 }
  0x29   : > { %p235_p0 = scmp.eq.s32.totalorder %s1581_s11, 7  ;;  %p2190_p2 = scmp.lt.s32.totalorder %s2581_s16, 8 }
  0x2a   : > { %s355_s25 = sand.u32 1, %s2577_s15   ;;  %p2737_p5 = por %p2927_p13, %p47_p8 }
  0x2b   : > { %p2741_p6 = por %p235_p0, %p53_p10  ;;  %s2745_s19 = sshll.u32 %s355_s25, 3 }
  0x2c   : > { %s1589_s23 = sshll.u32 %s2581_s16, 3  ;;  %s359_s11 = scalar_lea.vmem [#allocation5], %s2745_s19 }
  0x2d   : > { %s2947_s30 = scalar_select %p2741_p6, 1, 0 }
  0x2e   : > { %s363_s22 = scalar_lea.hbm %s2913_s0, %s1589_s23  ;;  %s367_s12 = sshll.u32 %s359_s11, 4  ;;  %s368_s12 = int_to_ptr.vmem [resolvable:$true] %s367_s12 }
  0x2f   : > { %2948 = sst [smem:[#allocation31_spill]] %s2947_s30  ;;  %s365_s2 = sshll.u32 %s363_s22, 4  ;;  %s366_s2 = int_to_ptr.hbm [resolvable:$true] %s365_s2 }
  0x30   : > { %p2754_p7 = pnand %p2190_p2, %p2722_p11  ;;  %s382_s18 = scalar_lea.hbm %s2914_s1, %s1589_s23 }
  0x31   : > { %s374_s15 = sand.u32 1, %s2581_s16   ;;  %s356_s17 = scalar_lea.sflag [#allocation6], %s355_s25 }
  0x32   : > { %s2379_s26 = sshra.s32 %s366_s2, 4  ;;  %p2383_p9 = pneg %p2754_p7  ;;  %s2380_s26 = int_to_ptr.hbm [resolvable:$true] %s2379_s26 }
  0x33   : > { %s2381_s29 = scalar_lea.hbm %s2380_s26, 8  ;;  %s2386_s11 = scalar_lea.hbm %s2913_s0, 64 }
  0x34   : > { %p2382_p8 = scmp.ne.s32.totalorder %s2380_s26, %s2381_s29  ;;  %p2387_p0 = scmp.lt.s32.totalorder %s2380_s26, %s2913_s0 }
  0x35   : > { %p2388_p2 = scmp.lt.s32.totalorder %s2386_s11, %s2381_s29 }
  0x36   : > { %p2384_p10 = pnand %p2383_p9, %p2382_p8 }
  0x37   : > { %p2389_p13 = por %p2388_p2, %p2387_p0 }
  0x38   : > { %p2385_p11 = pneg %p2384_p10 }
  0x3a   : > { %p2390_p3 = pnand %p2389_p13, %p2385_p11 }
  0x3c   : > { %2393 = shalt.err (!%p2390_p3)
}
  0x3d   : > { %2178 = dma.hbm_to_vmem [thread:$0]  (!%p2754_p7), %s366_s2, 128, %s368_s12, %s356_s17  }
  0x3e   : > { %s384_s25 = sshll.u32 %s382_s18, 4  ;;  %s378_s23 = scalar_lea.vmem [#allocation8], %s2745_s19  ;;  %s385_s25 = int_to_ptr.hbm [resolvable:$true] %s384_s25 }
  0x3f   : > { %s386_s30 = sshll.u32 %s378_s23, 4  ;;  %s375_s24 = scalar_lea.sflag [#allocation9], %s374_s15  ;;  %s387_s30 = int_to_ptr.vmem [resolvable:$true] %s386_s30 }
  0x40   : > { %s2409_s22 = sshra.s32 %s385_s25, 4  ;;  %s2416_s11 = scalar_lea.hbm %s2914_s1, 64  ;;  %s2410_s22 = int_to_ptr.hbm [resolvable:$true] %s2409_s22 }
  0x41   : > { %s2411_s13 = scalar_lea.hbm %s2410_s22, 8  ;;  %p2417_p3 = scmp.lt.s32.totalorder %s2410_s22, %s2914_s1 }
  0x42   : > { %p2412_p8 = scmp.ne.s32.totalorder %s2410_s22, %s2411_s13  ;;  %p2418_p11 = scmp.lt.s32.totalorder %s2416_s11, %s2411_s13 }
  0x44   : > { %p2414_p10 = pnand %p2412_p8, %p2383_p9  ;;  %p2419_p0 = por %p2418_p11, %p2417_p3 }
  0x46   : > { %p2415_p13 = pneg %p2414_p10 }
  0x48   : > { %p2420_p2 = pnand %p2419_p0, %p2415_p13 }
  0x4a   : > { %2423 = shalt.err (!%p2420_p2)
}
  0x4b   : > { %2181 = dma.hbm_to_vmem [thread:$0]  (!%p2754_p7), %s385_s25, 128, %s387_s30, %s375_s24  }
  0x4c   : > { %395 = sbr.rel (%p2678_p4) target bundleno = 506 (0x1fa), region = 52  ;;  %s2790_s15 = sand.u32 (!%p2678_p4), 1, %s2573_s14  }
  0x4d   : > { %s2793_s17 = sshll.u32 (!%p2678_p4), %s2790_s15, 3  ;;  %s398_s18 = scalar_lea.sflag (!%p2678_p4), [#allocation6], %s2790_s15 }
  0x4e   : > { %s401_s13 = scalar_lea.vmem (!%p2678_p4), [#allocation5], %s2793_s17 }
  0x51   : > { %2540 = dma.done.wait (%p2728_p12), %s398_s18, 128  }
  0x52   : > { %2542 = vsyncadd (%p2728_p12), %s398_s18, 4294967168  ;;  %s407_s3 = sand.u32 1, %s2672_s20   ;;  %s411_s30 = scalar_lea.vmem [#allocation8], %s2793_s17 }
  0x53   : > { %s408_s21 = scalar_lea.sflag [#allocation9], %s407_s3 }
  0x54   : > { %2544 = dma.done.wait (%p2728_p12), %s408_s21, 128  }
  0x55   : > { %2546 = vsyncadd (%p2728_p12), %s408_s21, 4294967168 }
  0x56   : > { %2548 = dma.done.wait (%p54_p1), [#allocation9], 128  }
  0x57   : > { %2550 = vsyncadd (%p54_p1), [#allocation9], 4294967168 }
  0x58   : > { %2552 = dma.done.wait (%p54_p1), [#allocation12], 12416  }
  0x59   : > { %2554 = vsyncadd (%p54_p1), [#allocation12], 4294954880 }
  0x5a   : > { %2556 = dma.done.wait (%p54_p1), [#allocation15], 1024  }
  0x5b   : > { %2558 = vsyncadd (%p54_p1), [#allocation15], 4294966272  ;;  %s469_s27 = scalar_lea.vmem [#allocation16], %s2793_s17  ;;  %p2950_p4 = scmp.ne.s32.totalorder %s2672_s20, 0 }
  0x5d   : > { %477 = sbr.rel (%p2950_p4) target bundleno = 101 (0x65), region = 80 }
  0x62   : > { %v478_v0 = vld [vmem:[#allocation10] sm:$0xff]  ;;  %v480_v1 = vld [vmem:[#allocation11] sm:$0xff] }
  0x63   : > { %479 = vst [vmem:[#allocation3] sm:$0xff] %v478_v0 }
  0x64   : > { %481 = vst [vmem:[#allocation4] sm:$0xff] %v480_v1 }
  0x65 PF: > { %v1715_v2 = vld [vmem:[#allocation13 + $0xe0] sm:$0xf]  ;;  %v2058_v3 = vld [vmem:[#allocation13 + $0xec] sm:$0xf0]  ;;  %v2056_v11 = vld [vmem:[#allocation13 + $0xe4] sm:$0xf] }
  0x66   : > { %v1843_v4 = vld [vmem:[#allocation13 + $0x1e0] sm:$0xf]  ;;  %v1716_v5 = vor.u32 %v2058_v3, %v1715_v2  ;;  %v2090_v6 = vld [vmem:[#allocation13 + $0x1ec] sm:$0xf0]  ;;  %v1717_v12 = vld [vmem:[#allocation13 + $0xf0] sm:$0xf0] }
  0x67   : > { %v1971_v7 = vld [vmem:[#allocation13 + $0x2e0] sm:$0xf]  ;;  %v2122_v8 = vld [vmem:[#allocation13 + $0x2ec] sm:$0xf0]  ;;  %v1844_v9 = vor.u32 %v2090_v6, %v1843_v4  ;;  %v1720_v14 = vor.u32 %v2056_v11, %v1717_v12  ;;  %v2052_v22 = vld [vmem:[#allocation13 + $0xc4] sm:$0xf] }
  0x68   : > { %v1972_v10 = vor.u32 %v2122_v8, %v1971_v7  ;;  %v1699_v13 = vld [vmem:[#allocation13 + $0xc0] sm:$0xf]  ;;  %1080 = vmatpush.bf16.msra.mxu0 %v1716_v5  ;;  %v2054_v15 = vld [vmem:[#allocation13 + $0xcc] sm:$0xf0]  ;;  %v1701_v24 = vld [vmem:[#allocation13 + $0xd0] sm:$0xf0] }
  0x69   : > { %v1827_v16 = vld [vmem:[#allocation13 + $0x1c0] sm:$0xf]  ;;  %v2086_v17 = vld [vmem:[#allocation13 + $0x1cc] sm:$0xf0]  ;;  %1093 = vmatpush.bf16.msra.mxu1 %v1844_v9  ;;  %v1700_v18 = vor.u32 %v2054_v15, %v1699_v13  ;;  %1119 = vmatpush.bf16.msra.mxu3 %v1720_v14  ;;  %v1704_v27 = vor.u32 %v2052_v22, %v1701_v24  ;;  %v2048_v33 = vld [vmem:[#allocation13 + $0xa4] sm:$0xf] }
  0x6a   : > { %1106 = vmatpush.bf16.msra.mxu2 %v1972_v10  ;;  %v1828_v19 = vor.u32 %v2086_v17, %v1827_v16  ;;  %v1955_v20 = vld [vmem:[#allocation13 + $0x2c0] sm:$0xf]  ;;  %v2118_v21 = vld [vmem:[#allocation13 + $0x2cc] sm:$0xf0]  ;;  %v1685_v34 = vld [vmem:[#allocation13 + $0xb0] sm:$0xf0] }
  0x6b   : > { %v1956_v23 = vor.u32 %v2118_v21, %v1955_v20  ;;  %v1683_v25 = vld [vmem:[#allocation13 + $0xa0] sm:$0xf]  ;;  %v2050_v26 = vld [vmem:[#allocation13 + $0xac] sm:$0xf0]  ;;  %v1688_v40 = vor.u32 %v2048_v33, %v1685_v34  ;;  %v2044_v44 = vld [vmem:[#allocation13 + $0x84] sm:$0xf] }
  0x6c   : > { %v1811_v28 = vld [vmem:[#allocation13 + $0x1a0] sm:$0xf]  ;;  %v2082_v29 = vld [vmem:[#allocation13 + $0x1ac] sm:$0xf0]  ;;  %1081 = vmatpush.bf16.msra.mxu0 %v1700_v18  ;;  %v1684_v31 = vor.u32 %v2050_v26, %v1683_v25  ;;  %v1669_v45 = vld [vmem:[#allocation13 + $0x90] sm:$0xf0] }
  0x6d   : > { %v1939_v30 = vld [vmem:[#allocation13 + $0x2a0] sm:$0xf]  ;;  %v2114_v32 = vld [vmem:[#allocation13 + $0x2ac] sm:$0xf0]  ;;  %1094 = vmatpush.bf16.msra.mxu1 %v1828_v19  ;;  %v1812_v35 = vor.u32 %v2082_v29, %v1811_v28  ;;  %1120 = vmatpush.bf16.msra.mxu3 %v1704_v27  ;;  %v1672_v52 = vor.u32 %v2044_v44, %v1669_v45  ;;  %v2040_v56 = vld [vmem:[#allocation13 + $0x64] sm:$0xf] }
  0x6e   : > { %1107 = vmatpush.bf16.msra.mxu2 %v1956_v23  ;;  %v1940_v36 = vor.u32 %v2114_v32, %v1939_v30  ;;  %v1667_v37 = vld [vmem:[#allocation13 + $0x80] sm:$0xf]  ;;  %v2046_v38 = vld [vmem:[#allocation13 + $0x8c] sm:$0xf0]  ;;  %v1653_v57 = vld [vmem:[#allocation13 + $0x70] sm:$0xf0] }
  0x6f   : > { %v1795_v39 = vld [vmem:[#allocation13 + $0x180] sm:$0xf]  ;;  %v2078_v41 = vld [vmem:[#allocation13 + $0x18c] sm:$0xf0]  ;;  %v1668_v46 = vor.u32 %v2046_v38, %v1667_v37  ;;  %v1656_v0 = vor.u32 %v2040_v56, %v1653_v57  ;;  %v2036_v4 = vld [vmem:[#allocation13 + $0x44] sm:$0xf] }
  0x70   : > { %v1923_v42 = vld [vmem:[#allocation13 + $0x280] sm:$0xf]  ;;  %v2110_v43 = vld [vmem:[#allocation13 + $0x28c] sm:$0xf0]  ;;  %1082 = vmatpush.bf16.msra.mxu0 %v1684_v31  ;;  %v1796_v47 = vor.u32 %v2078_v41, %v1795_v39  ;;  %v1637_v5 = vld [vmem:[#allocation13 + $0x50] sm:$0xf0] }
  0x71   : > { %1095 = vmatpush.bf16.msra.mxu1 %v1812_v35  ;;  %v1924_v48 = vor.u32 %v2110_v43, %v1923_v42  ;;  %v1651_v49 = vld [vmem:[#allocation13 + $0x60] sm:$0xf]  ;;  %v2042_v50 = vld [vmem:[#allocation13 + $0x6c] sm:$0xf0]  ;;  %1121 = vmatpush.bf16.msra.mxu3 %v1688_v40  ;;  %v1640_v12 = vor.u32 %v2036_v4, %v1637_v5  ;;  %v2032_v16 = vld [vmem:[#allocation13 + $0x24] sm:$0xf] }
  0x72   : > { %1108 = vmatpush.bf16.msra.mxu2 %v1940_v36  ;;  %v1779_v51 = vld [vmem:[#allocation13 + $0x160] sm:$0xf]  ;;  %v2074_v53 = vld [vmem:[#allocation13 + $0x16c] sm:$0xf0]  ;;  %v1652_v58 = vor.u32 %v2042_v50, %v1651_v49  ;;  %v1621_v17 = vld [vmem:[#allocation13 + $0x30] sm:$0xf0] }
  0x73   : > { %v1907_v54 = vld [vmem:[#allocation13 + $0x260] sm:$0xf]  ;;  %v2106_v55 = vld [vmem:[#allocation13 + $0x26c] sm:$0xf0]  ;;  %v1780_v59 = vor.u32 %v2074_v53, %v1779_v51  ;;  %v1624_v26 = vor.u32 %v2032_v16, %v1621_v17  ;;  %v2028_v28 = vld [vmem:[#allocation13 + $0x4] sm:$0xf] }
  0x74   : > { %1083 = vmatpush.bf16.msra.mxu0 %v1668_v46  ;;  %v1908_v60 = vor.u32 %v2106_v55, %v1907_v54  ;;  %v1635_v61 = vld [vmem:[#allocation13 + $0x40] sm:$0xf]  ;;  %v2038_v62 = vld [vmem:[#allocation13 + $0x4c] sm:$0xf0]  ;;  %v1605_v29 = vld [vmem:[#allocation13 + $0x10] sm:$0xf0] }
  0x75   : > { %1096 = vmatpush.bf16.msra.mxu1 %v1796_v47  ;;  %v1763_v63 = vld [vmem:[#allocation13 + $0x140] sm:$0xf]  ;;  %1122 = vmatpush.bf16.msra.mxu3 %v1672_v52  ;;  %v2070_v1 = vld [vmem:[#allocation13 + $0x14c] sm:$0xf0]  ;;  %v1636_v6 = vor.u32 %v2038_v62, %v1635_v61  ;;  %v2088_v30 = vld [vmem:[#allocation13 + $0x1e4] sm:$0xf]  ;;  %v1608_v41 = vor.u32 %v2028_v28, %v1605_v29 }
  0x76   : > { %1109 = vmatpush.bf16.msra.mxu2 %v1924_v48  ;;  %v1891_v2 = vld [vmem:[#allocation13 + $0x240] sm:$0xf]  ;;  %v2102_v3 = vld [vmem:[#allocation13 + $0x24c] sm:$0xf0]  ;;  %v1764_v7 = vor.u32 %v2070_v1, %v1763_v63  ;;  %v1845_v31 = vld [vmem:[#allocation13 + $0x1f0] sm:$0xf0] }
  0x77   : > { %v1892_v8 = vor.u32 %v2102_v3, %v1891_v2  ;;  %v1619_v9 = vld [vmem:[#allocation13 + $0x20] sm:$0xf]  ;;  %v2034_v10 = vld [vmem:[#allocation13 + $0x2c] sm:$0xf0]  ;;  %v2120_v32 = vld [vmem:[#allocation13 + $0x2e4] sm:$0xf]  ;;  %v1848_v42 = vor.u32 %v2088_v30, %v1845_v31 }
  0x78   : > { %1084 = vmatpush.bf16.msra.mxu0 %v1652_v58  ;;  %v1747_v11 = vld [vmem:[#allocation13 + $0x120] sm:$0xf]  ;;  %v2066_v13 = vld [vmem:[#allocation13 + $0x12c] sm:$0xf0]  ;;  %v1620_v18 = vor.u32 %v2034_v10, %v1619_v9  ;;  %v1973_v34 = vld [vmem:[#allocation13 + $0x2f0] sm:$0xf0] }
  0x79   : > { %1097 = vmatpush.bf16.msra.mxu1 %v1780_v59  ;;  %1123 = vmatpush.bf16.msra.mxu3 %v1656_v0  ;;  %v1875_v14 = vld [vmem:[#allocation13 + $0x220] sm:$0xf]  ;;  %v2098_v15 = vld [vmem:[#allocation13 + $0x22c] sm:$0xf0]  ;;  %v1748_v21 = vor.u32 %v2066_v13, %v1747_v11  ;;  %v1723_v35 = vld [vmem:[#allocation13 + $0xe8] sm:$0xf]  ;;  %v1976_v44 = vor.u32 %v2120_v32, %v1973_v34 }
  0x7a   : > { %1110 = vmatpush.bf16.msra.mxu2 %v1908_v60  ;;  %v1603_v19 = vld [vmem:[#allocation13] sm:$0xf]  ;;  %v2030_v20 = vld [vmem:[#allocation13 + $0xc] sm:$0xf0]  ;;  %v1876_v22 = vor.u32 %v2098_v15, %v1875_v14  ;;  %v2059_v36 = vld [vmem:[#allocation13 + $0xf4] sm:$0xf0] }
  0x7b   : > { %v1731_v23 = vld [vmem:[#allocation13 + $0x100] sm:$0xf]  ;;  %v2062_v24 = vld [vmem:[#allocation13 + $0x10c] sm:$0xf0]  ;;  %v1604_v33 = vor.u32 %v2030_v20, %v1603_v19  ;;  %v1851_v39 = vld [vmem:[#allocation13 + $0x1e8] sm:$0xf]  ;;  %v1724_v45 = vor.u32 %v2059_v36, %v1723_v35 }
  0x7c   : > { %1085 = vmatpush.bf16.msra.mxu0 %v1636_v6  ;;  %v1859_v25 = vld [vmem:[#allocation13 + $0x200] sm:$0xf]  ;;  %v2094_v27 = vld [vmem:[#allocation13 + $0x20c] sm:$0xf0]  ;;  %v1732_v37 = vor.u32 %v2062_v24, %v1731_v23  ;;  %v2091_v40 = vld [vmem:[#allocation13 + $0x1f4] sm:$0xf0] }
  0x7d   : > { %1098 = vmatpush.bf16.msra.mxu1 %v1764_v7  ;;  %1124 = vmatpush.bf16.msra.mxu3 %v1640_v12  ;;  %v1860_v38 = vor.u32 %v2094_v27, %v1859_v25  ;;  %v2084_v43 = vld [vmem:[#allocation13 + $0x1c4] sm:$0xf]  ;;  %v1829_v46 = vld [vmem:[#allocation13 + $0x1d0] sm:$0xf0]  ;;  %v1852_v49 = vor.u32 %v2091_v40, %v1851_v39  ;;  %v1707_v50 = vld [vmem:[#allocation13 + $0xc8] sm:$0xf] }
  0x7e   : > { %1111 = vmatpush.bf16.msra.mxu2 %v1892_v8  ;;  %v2116_v47 = vld [vmem:[#allocation13 + $0x2c4] sm:$0xf]  ;;  %v1957_v48 = vld [vmem:[#allocation13 + $0x2d0] sm:$0xf0]  ;;  %v2055_v51 = vld [vmem:[#allocation13 + $0xd4] sm:$0xf0]  ;;  %v1832_v56 = vor.u32 %v2084_v43, %v1829_v46 }
  0x7f   : > { %v1835_v52 = vld [vmem:[#allocation13 + $0x1c8] sm:$0xf]  ;;  %v2087_v53 = vld [vmem:[#allocation13 + $0x1d4] sm:$0xf0]  ;;  %v486_v55 = vld [vmem:[#allocation3] sm:$0xff]  ;;  %v1960_v60 = vor.u32 %v2116_v47, %v1957_v48  ;;  %v1708_v61 = vor.u32 %v2055_v51, %v1707_v50  ;;  %s1414_s23 = sshll.u32 %s2922_s9, 4  ;;  %s1415_s23 = int_to_ptr.hbm [resolvable:$true] %s1414_s23 }
  0x80   : > { %1086 = vmatpush.bf16.msra.mxu0 %v1620_v18  ;;  %v482_v54 = vld [vmem:[%s401_s13] sm:$0xff]  ;;  %v2080_v57 = vld [vmem:[#allocation13 + $0x1a4] sm:$0xf]  ;;  %v2826_v59 = vpack.c.bf16 %v486_v55, %v486_v55  ;;  %v1836_v1 = vor.u32 %v2087_v53, %v1835_v52  ;;  %v1691_v2 = vld [vmem:[#allocation13 + $0xa8] sm:$0xf]  ;;  %s2591_s24 = smov [#allocation17]  }
  0x81   : > { %1099 = vmatpush.bf16.msra.mxu1 %v1748_v21  ;;  %1125 = vmatpush.bf16.msra.mxu3 %v1624_v26  ;;  %v2824_v58 = vpack.c.bf16 %v482_v54, %v482_v54  ;;  %v1813_v62 = vld [vmem:[#allocation13 + $0x1b0] sm:$0xf0]  ;;  %v2112_v63 = vld [vmem:[#allocation13 + $0x2a4] sm:$0xf]  ;;  %v2051_v3 = vld [vmem:[#allocation13 + $0xb4] sm:$0xf0] }
  0x82   : > { %1112 = vmatpush.bf16.msra.mxu2 %v1876_v22  ;;  %v1941_v0 = vld [vmem:[#allocation13 + $0x2b0] sm:$0xf0]  ;;  %v484_v4 = vld [vmem:[%s411_s30] sm:$0xff]  ;;  %v2083_v6 = vld [vmem:[#allocation13 + $0x1b4] sm:$0xf0]  ;;  %v1816_v8 = vor.u32 %v2080_v57, %v1813_v62  ;;  %v1692_v10 = vor.u32 %v2051_v3, %v1691_v2  ;;  %s1412_s22 = sshll.u32 %s2591_s24, 4  ;;  %s1413_s22 = int_to_ptr.vmem [resolvable:$true] %s1412_s22 }
  0x83   : > { %v1819_v5 = vld [vmem:[#allocation13 + $0x1a8] sm:$0xf]  ;;  %v2832_v7 = vpack.c.bf16 %v484_v4, %v484_v4  ;;  %v1944_v9 = vor.u32 %v2112_v63, %v1941_v0  ;;  %v2076_v11 = vld [vmem:[#allocation13 + $0x184] sm:$0xf]  ;;  %v1797_v12 = vld [vmem:[#allocation13 + $0x190] sm:$0xf0] }
  0x84   : > { %1087 = vmatpush.bf16.msra.mxu0 %v1604_v33  ;;  %v2108_v13 = vld [vmem:[#allocation13 + $0x284] sm:$0xf]  ;;  %v1820_v14 = vor.u32 %v2083_v6, %v1819_v5  ;;  %v1925_v15 = vld [vmem:[#allocation13 + $0x290] sm:$0xf0]  ;;  %v1675_v16 = vld [vmem:[#allocation13 + $0x88] sm:$0xf]  ;;  %v1800_v20 = vor.u32 %v2076_v11, %v1797_v12 }
  0x85   : > { %1100 = vmatpush.bf16.msra.mxu1 %v1732_v37  ;;  %1126 = vmatpush.bf16.msra.mxu3 %v1608_v41  ;;  %v2047_v17 = vld [vmem:[#allocation13 + $0x94] sm:$0xf0]  ;;  %v1803_v18 = vld [vmem:[#allocation13 + $0x188] sm:$0xf]  ;;  %v1928_v21 = vor.u32 %v2108_v13, %v1925_v15  ;;  %v2072_v23 = vld [vmem:[#allocation13 + $0x164] sm:$0xf] }
  0x86   : > { %1113 = vmatpush.bf16.msra.mxu2 %v1860_v38  ;;  %v2079_v19 = vld [vmem:[#allocation13 + $0x194] sm:$0xf0]  ;;  %v1676_v22 = vor.u32 %v2047_v17, %v1675_v16  ;;  %v1781_v24 = vld [vmem:[#allocation13 + $0x170] sm:$0xf0]  ;;  %v2104_v25 = vld [vmem:[#allocation13 + $0x264] sm:$0xf] }
  0x87   : > { %1088 = vmatmul.bf16.vlgmr.msra.gmra.mxu0 %v2824_v58  ;;  %v1804_v26 = vor.u32 %v2079_v19, %v1803_v18  ;;  %v1909_v27 = vld [vmem:[#allocation13 + $0x270] sm:$0xf0]  ;;  %v1659_v28 = vld [vmem:[#allocation13 + $0x68] sm:$0xf]  ;;  %v2043_v29 = vld [vmem:[#allocation13 + $0x74] sm:$0xf0]  ;;  %v1784_v32 = vor.u32 %v2072_v23, %v1781_v24 }
  0x88   : > { %1132 = vmatpush.bf16.msrb.mxu0 %v1848_v42  ;;  %1127 = vmatmul.bf16.vlgmr.msra.gmra.mxu3 %v2824_v58  ;;  %v1787_v30 = vld [vmem:[#allocation13 + $0x168] sm:$0xf]  ;;  %v2075_v31 = vld [vmem:[#allocation13 + $0x174] sm:$0xf0]  ;;  %v1912_v33 = vor.u32 %v2104_v25, %v1909_v27  ;;  %v1660_v34 = vor.u32 %v2043_v29, %v1659_v28  ;;  %v2068_v35 = vld [vmem:[#allocation13 + $0x144] sm:$0xf] }
  0x89   : > { %1145 = vmatpush.bf16.msrb.mxu1 %v1976_v44  ;;  %1171 = vmatpush.bf16.msrb.mxu3 %v1852_v49  ;;  %v1765_v36 = vld [vmem:[#allocation13 + $0x150] sm:$0xf0]  ;;  %v2100_v37 = vld [vmem:[#allocation13 + $0x244] sm:$0xf]  ;;  %v1788_v38 = vor.u32 %v2075_v31, %v1787_v30  ;;  %v1643_v40 = vld [vmem:[#allocation13 + $0x48] sm:$0xf] }
  0x8a   : > { %1158 = vmatpush.bf16.msrb.mxu2 %v1724_v45  ;;  %1101 = vmatmul.bf16.vlgmr.msra.gmra.mxu1 %v2832_v7  ;;  %v1893_v39 = vld [vmem:[#allocation13 + $0x250] sm:$0xf0]  ;;  %v2039_v41 = vld [vmem:[#allocation13 + $0x54] sm:$0xf0]  ;;  %v1771_v42 = vld [vmem:[#allocation13 + $0x148] sm:$0xf]  ;;  %v1768_v44 = vor.u32 %v2068_v35, %v1765_v36 }
  0x8b   : > { %1114 = vmatmul.bf16.vlgmr.msra.gmra.mxu2 %v2826_v59  ;;  %v2071_v43 = vld [vmem:[#allocation13 + $0x154] sm:$0xf0]  ;;  %v1896_v45 = vor.u32 %v2100_v37, %v1893_v39  ;;  %v1644_v46 = vor.u32 %v2039_v41, %v1643_v40  ;;  %v2064_v47 = vld [vmem:[#allocation13 + $0x124] sm:$0xf]  ;;  %v1749_v48 = vld [vmem:[#allocation13 + $0x130] sm:$0xf0] }
  0x8c   : > { %1133 = vmatpush.bf16.msrb.mxu0 %v1832_v56  ;;  %v2096_v49 = vld [vmem:[#allocation13 + $0x224] sm:$0xf]  ;;  %v1772_v50 = vor.u32 %v2071_v43, %v1771_v42  ;;  %v1877_v51 = vld [vmem:[#allocation13 + $0x230] sm:$0xf0]  ;;  %v1627_v52 = vld [vmem:[#allocation13 + $0x28] sm:$0xf]  ;;  %v1752_v56 = vor.u32 %v2064_v47, %v1749_v48 }
  0x8d   : > { %1146 = vmatpush.bf16.msrb.mxu1 %v1960_v60  ;;  %1172 = vmatpush.bf16.msrb.mxu3 %v1836_v1  ;;  %v2035_v53 = vld [vmem:[#allocation13 + $0x34] sm:$0xf0]  ;;  %v1755_v54 = vld [vmem:[#allocation13 + $0x128] sm:$0xf]  ;;  %v2060_v57 = vld [vmem:[#allocation13 + $0x104] sm:$0xf] }
  0x8e   : > { %1159 = vmatpush.bf16.msrb.mxu2 %v1708_v61  ;;  %v2067_v55 = vld [vmem:[#allocation13 + $0x134] sm:$0xf0]  ;;  %v1733_v60 = vld [vmem:[#allocation13 + $0x110] sm:$0xf0]  ;;  %v1880_v61 = vor.u32 %v2096_v49, %v1877_v51  ;;  %v1628_v62 = vor.u32 %v2035_v53, %v1627_v52  ;;  %v2092_v63 = vld [vmem:[#allocation13 + $0x204] sm:$0xf] }
  0x8f   : > { %v1861_v0 = vld [vmem:[#allocation13 + $0x210] sm:$0xf0]  ;;  %v1611_v1 = vld [vmem:[#allocation13 + $0x8] sm:$0xf]  ;;  %v1756_v2 = vor.u32 %v2067_v55, %v1755_v54  ;;  %v2031_v3 = vld [vmem:[#allocation13 + $0x14] sm:$0xf0] }
  0x90   : > { %1134 = vmatpush.bf16.msrb.mxu0 %v1816_v8  ;;  %v1739_v4 = vld [vmem:[#allocation13 + $0x108] sm:$0xf]  ;;  %v2063_v5 = vld [vmem:[#allocation13 + $0x114] sm:$0xf0]  ;;  %v1725_v11 = vld [vmem:[#allocation13 + $0xf8] sm:$0xf0]  ;;  %v1612_v15 = vor.u32 %v2031_v3, %v1611_v1 }
  0x91   : > { %1147 = vmatpush.bf16.msrb.mxu1 %v1944_v9  ;;  %1173 = vmatpush.bf16.msrb.mxu3 %v1820_v14  ;;  %v1979_v6 = vld [vmem:[#allocation13 + $0x2e8] sm:$0xf]  ;;  %v2123_v8 = vld [vmem:[#allocation13 + $0x2f4] sm:$0xf0]  ;;  %v2057_v9 = vld [vmem:[#allocation13 + $0xec] sm:$0xf]  ;;  %v1864_v14 = vor.u32 %v2092_v63, %v1861_v0  ;;  %v1740_v18 = vor.u32 %v2063_v5, %v1739_v4 }
  0x92   : > { %1160 = vmatpush.bf16.msrb.mxu2 %v1692_v10  ;;  %v1736_v10 = vor.u32 %v2060_v57, %v1733_v60  ;;  %v2089_v12 = vld [vmem:[#allocation13 + $0x1ec] sm:$0xf]  ;;  %v1853_v13 = vld [vmem:[#allocation13 + $0x1f8] sm:$0xf0]  ;;  %v1980_v19 = vor.u32 %v2123_v8, %v1979_v6  ;;  %v2119_v23 = vld [vmem:[#allocation13 + $0x2d4] sm:$0xf0] }
  0x93   : > { %v2121_v16 = vld [vmem:[#allocation13 + $0x2ec] sm:$0xf]  ;;  %v1981_v17 = vld [vmem:[#allocation13 + $0x2f8] sm:$0xf0]  ;;  %v2115_v35 = vld [vmem:[#allocation13 + $0x2b4] sm:$0xf0] }
  0x94   : > { %1135 = vmatpush.bf16.msrb.mxu0 %v1800_v20  ;;  %v1728_v20 = vor.u32 %v2057_v9, %v1725_v11  ;;  %v2053_v24 = vld [vmem:[#allocation13 + $0xcc] sm:$0xf]  ;;  %v1984_v25 = vor.u32 %v2121_v16, %v1981_v17  ;;  %v1837_v28 = vld [vmem:[#allocation13 + $0x1d8] sm:$0xf0]  ;;  %v2111_v47 = vld [vmem:[#allocation13 + $0x294] sm:$0xf0] }
  0x95   : > { %1148 = vmatpush.bf16.msrb.mxu1 %v1928_v21  ;;  %1174 = vmatpush.bf16.msrb.mxu3 %v1804_v26  ;;  %v1856_v21 = vor.u32 %v2089_v12, %v1853_v13  ;;  %v1709_v26 = vld [vmem:[#allocation13 + $0xd8] sm:$0xf0]  ;;  %v2085_v27 = vld [vmem:[#allocation13 + $0x1cc] sm:$0xf]  ;;  %v1915_v60 = vld [vmem:[#allocation13 + $0x268] sm:$0xf] }
  0x96   : > { %1161 = vmatpush.bf16.msrb.mxu2 %v1676_v22  ;;  %v1963_v22 = vld [vmem:[#allocation13 + $0x2c8] sm:$0xf]  ;;  %v2117_v29 = vld [vmem:[#allocation13 + $0x2cc] sm:$0xf]  ;;  %v1965_v30 = vld [vmem:[#allocation13 + $0x2d8] sm:$0xf0] }
  0x97   : > { %v1964_v31 = vor.u32 %v2119_v23, %v1963_v22  ;;  %v2049_v36 = vld [vmem:[#allocation13 + $0xac] sm:$0xf]  ;;  %v1693_v37 = vld [vmem:[#allocation13 + $0xb8] sm:$0xf0]  ;;  %v1899_v9 = vld [vmem:[#allocation13 + $0x248] sm:$0xf] }
  0x98   : > { %1136 = vmatpush.bf16.msrb.mxu0 %v1784_v32  ;;  %v1947_v32 = vld [vmem:[#allocation13 + $0x2a8] sm:$0xf]  ;;  %v2081_v39 = vld [vmem:[#allocation13 + $0x1ac] sm:$0xf]  ;;  %v1821_v40 = vld [vmem:[#allocation13 + $0x1b8] sm:$0xf0] }
  0x99   : > { %1149 = vmatpush.bf16.msrb.mxu1 %v1912_v33  ;;  %1175 = vmatpush.bf16.msrb.mxu3 %v1788_v38  ;;  %v1712_v33 = vor.u32 %v2053_v24, %v1709_v26  ;;  %v1968_v38 = vor.u32 %v2117_v29, %v1965_v30  ;;  %v2113_v41 = vld [vmem:[#allocation13 + $0x2ac] sm:$0xf]  ;;  %v1949_v42 = vld [vmem:[#allocation13 + $0x2b8] sm:$0xf0]  ;;  %v1948_v43 = vor.u32 %v2115_v35, %v1947_v32  ;;  %v2099_v22 = vld [vmem:[#allocation13 + $0x234] sm:$0xf0] }
  0x9a   : > { %1162 = vmatpush.bf16.msrb.mxu2 %v1660_v34  ;;  %v1840_v34 = vor.u32 %v2085_v27, %v1837_v28  ;;  %v2045_v48 = vld [vmem:[#allocation13 + $0x8c] sm:$0xf]  ;;  %v1952_v49 = vor.u32 %v2113_v41, %v1949_v42  ;;  %v1805_v52 = vld [vmem:[#allocation13 + $0x198] sm:$0xf0]  ;;  %p2953_p1 = scmp.eq.s32.totalorder %s2672_s20, 7  ;;  %s2592_s26 = smov [#allocation19]  }
  0x9b   : > { %v2077_v51 = vld [vmem:[#allocation13 + $0x18c] sm:$0xf]  ;;  %v1933_v54 = vld [vmem:[#allocation13 + $0x298] sm:$0xf0]  ;;  %s1424_s29 = sshll.u32 %s2592_s26, 4  ;;  %s1426_s2 = sshll.u32 %s2923_s10, 4  ;;  %s1425_s29 = int_to_ptr.vmem [resolvable:$true] %s1424_s29  ;;  %s1427_s2 = int_to_ptr.hbm [resolvable:$true] %s1426_s2 }
  0x9c   : > { %1137 = vmatpush.bf16.msrb.mxu0 %v1768_v44  ;;  %v1696_v44 = vor.u32 %v2049_v36, %v1693_v37  ;;  %v2109_v53 = vld [vmem:[#allocation13 + $0x28c] sm:$0xf]  ;;  %v1808_v57 = vor.u32 %v2077_v51, %v1805_v52  ;;  %v1661_v0 = vld [vmem:[#allocation13 + $0x78] sm:$0xf0]  ;;  %p2954_p12 = pmov %p2953_p1  ;;  %s2021_s18 = sshll.u32 %s2672_s20, 3 }
  0x9d   : > { %1150 = vmatpush.bf16.msrb.mxu1 %v1896_v45  ;;  %1176 = vmatpush.bf16.msrb.mxu3 %v1772_v50  ;;  %v1824_v45 = vor.u32 %v2081_v39, %v1821_v40  ;;  %v1677_v50 = vld [vmem:[#allocation13 + $0x98] sm:$0xf0]  ;;  %v1936_v63 = vor.u32 %v2109_v53, %v1933_v54  ;;  %v2073_v1 = vld [vmem:[#allocation13 + $0x16c] sm:$0xf]  ;;  %s1398_s21 = scalar_lea.hbm %s2921_s8, %s2021_s18  ;;  %s1400_s12 = sshll.u32 %s469_s27, 4  ;;  %s1401_s12 = int_to_ptr.vmem [resolvable:$true] %s1400_s12 }
  0x9e   : > { %1163 = vmatpush.bf16.msrb.mxu2 %v1644_v46  ;;  %v1931_v46 = vld [vmem:[#allocation13 + $0x288] sm:$0xf]  ;;  %v2105_v3 = vld [vmem:[#allocation13 + $0x26c] sm:$0xf]  ;;  %v1917_v4 = vld [vmem:[#allocation13 + $0x278] sm:$0xf0] }
  0x9f   : > { %v1932_v55 = vor.u32 %v2111_v47, %v1931_v46  ;;  %v2037_v11 = vld [vmem:[#allocation13 + $0x4c] sm:$0xf]  ;;  %v1920_v12 = vor.u32 %v2105_v3, %v1917_v4  ;;  %v1645_v13 = vld [vmem:[#allocation13 + $0x58] sm:$0xf0]  ;;  %v2847_v47 = vld [vmem:[%s2918_s5] sm:$0xf] }
  0xa0   : > { %1138 = vmatpush.bf16.msrb.mxu0 %v1752_v56  ;;  %v1680_v56 = vor.u32 %v2045_v48, %v1677_v50  ;;  %v2101_v16 = vld [vmem:[#allocation13 + $0x24c] sm:$0xf]  ;;  %v1901_v17 = vld [vmem:[#allocation13 + $0x258] sm:$0xf0]  ;;  %s1402_s6 = sshll.u32 %s1398_s21, 4  ;;  %s1388_s25 = scalar_lea.sflag [#allocation7], %s2790_s15  ;;  %s1403_s6 = int_to_ptr.hbm [resolvable:$true] %s1402_s6 }
  0xa1   : > { %1151 = vmatpush.bf16.msrb.mxu1 %v1880_v61  ;;  %1177 = vmatpush.bf16.msrb.mxu3 %v1756_v2  ;;  %v2107_v61 = vld [vmem:[#allocation13 + $0x274] sm:$0xf0]  ;;  %v1789_v2 = vld [vmem:[#allocation13 + $0x178] sm:$0xf0]  ;;  %v2033_v23 = vld [vmem:[#allocation13 + $0x2c] sm:$0xf]  ;;  %v1904_v24 = vor.u32 %v2101_v16, %v1901_v17 }
  0xa2   : > { %1164 = vmatpush.bf16.msrb.mxu2 %v1628_v62  ;;  %v2041_v62 = vld [vmem:[#allocation13 + $0x6c] sm:$0xf]  ;;  %v1916_v5 = vor.u32 %v2107_v61, %v1915_v60  ;;  %v1792_v8 = vor.u32 %v2073_v1, %v1789_v2  ;;  %v1757_v27 = vld [vmem:[#allocation13 + $0x138] sm:$0xf0] }
  0xa3   : > { %v1664_v6 = vor.u32 %v2041_v62, %v1661_v0  ;;  %v2065_v26 = vld [vmem:[#allocation13 + $0x12c] sm:$0xf]  ;;  %v1885_v29 = vld [vmem:[#allocation13 + $0x238] sm:$0xf0] }
  0xa4   : > { %1139 = vmatpush.bf16.msrb.mxu0 %v1736_v10  ;;  %v2103_v10 = vld [vmem:[#allocation13 + $0x254] sm:$0xf0]  ;;  %v2097_v28 = vld [vmem:[#allocation13 + $0x22c] sm:$0xf]  ;;  %v1760_v32 = vor.u32 %v2065_v26, %v1757_v27  ;;  %v1613_v37 = vld [vmem:[#allocation13 + $0x18] sm:$0xf0] }
  0xa5   : > { %1152 = vmatpush.bf16.msrb.mxu1 %v1864_v14  ;;  %1178 = vmatpush.bf16.msrb.mxu3 %v1740_v18  ;;  %v2069_v14 = vld [vmem:[#allocation13 + $0x14c] sm:$0xf]  ;;  %v1900_v18 = vor.u32 %v2103_v10, %v1899_v9  ;;  %v1888_v36 = vor.u32 %v2097_v28, %v1885_v29  ;;  %v1741_v39 = vld [vmem:[#allocation13 + $0x118] sm:$0xf0] }
  0xa6   : > { %1165 = vmatpush.bf16.msrb.mxu2 %v1612_v15  ;;  %v1773_v15 = vld [vmem:[#allocation13 + $0x158] sm:$0xf0]  ;;  %v2029_v35 = vld [vmem:[#allocation13 + $0xc] sm:$0xf] }
  0xa7   : > { %1140 = vmatmul.bf16.vlgmr.msrb.gmra.mxu0 %v2832_v7  ;;  %v2093_v40 = vld [vmem:[#allocation13 + $0x20c] sm:$0xf]  ;;  %v1869_v41 = vld [vmem:[#allocation13 + $0x218] sm:$0xf0] }
  0xa8   : > { %1184 = vmatpush.bf16.msra.mxu0 %v1980_v19  ;;  %1153 = vmatmul.bf16.vlgmr.msrb.gmra.mxu1 %v2826_v59  ;;  %v1648_v19 = vor.u32 %v2037_v11, %v1645_v13  ;;  %v2131_v9 = vld [vmem:[#allocation14 + $0x38] sm:$0xff]  ;;  %v2130_v11 = vld [vmem:[#allocation14 + $0x30] sm:$0xff]  ;;  %v2129_v16 = vld [vmem:[#allocation14 + $0x28] sm:$0xff] }
  0xa9   : > { %1197 = vmatpush.bf16.msra.mxu1 %v1728_v20  ;;  %1223 = vmatpush.bf16.msra.mxu3 %v1984_v25  ;;  %v1776_v20 = vor.u32 %v2069_v14, %v1773_v15  ;;  %v1629_v25 = vld [vmem:[#allocation13 + $0x38] sm:$0xf0] }
  0xaa   : > { %1210 = vmatpush.bf16.msra.mxu2 %v1856_v21  ;;  %1179 = vmatmul.bf16.vlgmr.msrb.gmra.mxu3 %v2832_v7  ;;  %v1883_v21 = vld [vmem:[#allocation13 + $0x228] sm:$0xf] }
  0xab   : > { %1166 = vmatmul.bf16.vlgmr.msrb.gmra.mxu2 %v2824_v58  ;;  %v1884_v30 = vor.u32 %v2099_v22, %v1883_v21 }
  0xac   : > { %1185 = vmatpush.bf16.msra.mxu0 %v1964_v31  ;;  %v1632_v31 = vor.u32 %v2033_v23, %v1629_v25  ;;  %v2127_v25 = vld [vmem:[#allocation14 + $0x18] sm:$0xff] }
  0xad   : > { %1198 = vmatpush.bf16.msra.mxu1 %v1712_v33  ;;  %1224 = vmatpush.bf16.msra.mxu3 %v1968_v38  ;;  %v1867_v33 = vld [vmem:[#allocation13 + $0x208] sm:$0xf]  ;;  %v2061_v38 = vld [vmem:[#allocation13 + $0x10c] sm:$0xf] }
  0xae   : > { %1211 = vmatpush.bf16.msra.mxu2 %v1840_v34  ;;  %v2095_v34 = vld [vmem:[#allocation13 + $0x214] sm:$0xf0] }
  0xaf   : > { %v1868_v42 = vor.u32 %v2095_v34, %v1867_v33 }
  0xb0   : > { %1186 = vmatpush.bf16.msra.mxu0 %v1948_v43  ;;  %v1616_v43 = vor.u32 %v2029_v35, %v1613_v37 }
  0xb1   : > { %1199 = vmatpush.bf16.msra.mxu1 %v1696_v44  ;;  %1225 = vmatpush.bf16.msra.mxu3 %v1952_v49  ;;  %v1744_v44 = vor.u32 %v2061_v38, %v1741_v39  ;;  %v592_v49 = vperm.slane %v2847_v47, 0 }
  0xb2   : > { %1212 = vmatpush.bf16.msra.mxu2 %v1824_v45  ;;  %v1872_v45 = vor.u32 %v2093_v40, %v1869_v41  ;;  %v2125_v41 = vld [vmem:[#allocation14 + $0x8] sm:$0xff] }
  0xb4   : > { %1187 = vmatpush.bf16.msra.mxu0 %v1932_v55 }
  0xb5   : > { %1200 = vmatpush.bf16.msra.mxu1 %v1680_v56  ;;  %1226 = vmatpush.bf16.msra.mxu3 %v1936_v63 }
  0xb6   : > { %1213 = vmatpush.bf16.msra.mxu2 %v1808_v57 }
  0xb8   : > { %1188 = vmatpush.bf16.msra.mxu0 %v1916_v5 }
  0xb9   : > { %1201 = vmatpush.bf16.msra.mxu1 %v1664_v6  ;;  %1227 = vmatpush.bf16.msra.mxu3 %v1920_v12 }
  0xba   : > { %1214 = vmatpush.bf16.msra.mxu2 %v1792_v8 }
  0xbc   : > { %1189 = vmatpush.bf16.msra.mxu0 %v1900_v18  ;;  %v594_v18 = vperm.slane %v2847_v47, 2 }
  0xbd   : > { %1202 = vmatpush.bf16.msra.mxu1 %v1648_v19  ;;  %1228 = vmatpush.bf16.msra.mxu3 %v1904_v24  ;;  %v2128_v19 = vld [vmem:[#allocation14 + $0x20] sm:$0xff] }
  0xbe   : > { %1215 = vmatpush.bf16.msra.mxu2 %v1776_v20 }
  0xc0   : > { %1190 = vmatpush.bf16.msra.mxu0 %v1884_v30 }
  0xc1   : > { %1203 = vmatpush.bf16.msra.mxu1 %v1632_v31  ;;  %1229 = vmatpush.bf16.msra.mxu3 %v1888_v36  ;;  %v595_v31 = vperm.slane %v2847_v47, 3 }
  0xc2   : > { %1216 = vmatpush.bf16.msra.mxu2 %v1760_v32  ;;  %v2126_v32 = vld [vmem:[#allocation14 + $0x10] sm:$0xff] }
  0xc4   : > { %1191 = vmatpush.bf16.msra.mxu0 %v1868_v42 }
  0xc5   : > { %1204 = vmatpush.bf16.msra.mxu1 %v1616_v43  ;;  %1230 = vmatpush.bf16.msra.mxu3 %v1872_v45 }
  0xc6   : > { %1217 = vmatpush.bf16.msra.mxu2 %v1744_v44 }
  0xc7   : > { %1192 = vmatmul.bf16.vlgmr.msra.gmra.mxu0 %v2826_v59 }
  0xc8   : > { %1205 = vmatmul.bf16.vlgmr.msra.gmra.mxu1 %v2824_v58  ;;  %1231 = vmatmul.bf16.vlgmr.msra.gmra.mxu3 %v2826_v59  ;;  %v593_v59 = vperm.slane %v2847_v47, 1  ;;  %v2124_v47 = vld [vmem:[#allocation14] sm:$0xff] }
  0xc9   : > { %1218 = vmatmul.bf16.vlgmr.msra.gmra.mxu2 %v2832_v7  ;;  %1371 = vmatpush.bf16.msrb.mxu0 %v2131_v9 }
  0xcd   : > { %1372 = vmatpush.bf16.msrb.mxu0 %v2130_v11 }
  0xd1   : > { %1373 = vmatpush.bf16.msrb.mxu0 %v2129_v16 }
  0xd5   : > { %1374 = vmatpush.bf16.msrb.mxu0 %v2128_v19 }
  0xd9   : > { %1375 = vmatpush.bf16.msrb.mxu0 %v2127_v25 }
  0xdd   : > { %1376 = vmatpush.bf16.msrb.mxu0 %v2126_v32 }
  0xe1   : > { %1377 = vmatpush.bf16.msrb.mxu0 %v2125_v41 }
  0xe5   : > { %1378 = vmatpush.bf16.msrb.mxu0 %v2124_v47 }
 0x104   : > { %v1089_v46 = vpop.f32.mrf.mxu0 }
 0x105   : > { %v1090_v53 = vadd.f32 %v1089_v46, %v592_v49  ;;  %v1294_v49 = vld [vmem:[#allocation4] sm:$0xff] }
 0x107   : > { %v1102_v48 = vpop.f32.mrf.mxu1 }
 0x108   : > { %v1103_v55 = vadd.f32 %v1102_v48, %v1090_v53 }
 0x10b   : > { %v1128_v51 = vpop.f32.mrf.mxu3 }
 0x10c   : > { %v1091_v52 = vpop.f32.mrf.mxu0  ;;  %v1129_v60 = vadd.f32 %v1128_v51, %v593_v59 }
 0x10e   : > { %v1115_v50 = vpop.f32.mrf.mxu2 }
 0x10f   : > { %v1104_v54 = vpop.f32.mrf.mxu1  ;;  %v1116_v7 = vadd.f32 %v1115_v50, %v1103_v55 }
 0x111   : > { %v1985_v57 = vmul.f32 -1.442695, %v1116_v7 }
 0x113   : > { %v1130_v56 = vpop.f32.mrf.mxu3  ;;  %2243 = vpow2.f32 %v1985_v57 }
 0x116   : > { %v1117_v58 = vpop.f32.mrf.mxu2 }
 0x119   : > { %v2244_v0 = vpop.eup %2243 }
 0x11a   : > { %v1239_v3 = vadd.f32 1.0, %v2244_v0 }
 0x11c   : > { %vm1245_vm0 = vweird.f32 %v1239_v3  ;;  %v1251_v35 = vand.u32 2147483648, %v1239_v3  ;;  %v1249_v39 = vand.u32 2147483647, %v1239_v3 }
 0x11e   : > { %v1252_v45 = vor.u32 1.1754944e-38, %v1251_v35  ;;  %vm1250_vm6 = vcmp.eq.f32.partialorder %v1249_v39, 8.507059e+37 }
 0x124   : > { %v1141_v61 = vpop.f32.mrf.mxu0 }
 0x125   : > { %v1142_v62 = vadd.f32 %v1141_v61, %v1129_v60  ;;  %v1154_v63 = vpop.f32.mrf.mxu1 }
 0x127   : > { %v1155_v1 = vadd.f32 %v1154_v63, %v1142_v62 }
 0x129   : > { %v1986_v2 = vmul.f32 -1.442695, %v1155_v1 }
 0x12b   : > { %2245 = vpow2.f32 %v1986_v2 }
 0x12c   : > { %v1143_v6 = vpop.f32.mrf.mxu0  ;;  %2247 = vrcp.f32 %v1239_v3 }
 0x12d   : > { %v1180_v5 = vpop.f32.mrf.mxu3  ;;  %v1156_v8 = vpop.f32.mrf.mxu1 }
 0x12e   : > { %v1167_v4 = vpop.f32.mrf.mxu2 }
 0x12f   : > { %v1168_v23 = vadd.f32 %v1167_v4, %v594_v18 }
 0x131   : > { %v2246_v10 = vpop.eup %2245  ;;  %v1181_v28 = vadd.f32 %v1180_v5, %v1168_v23 }
 0x132   : > { %v1258_v12 = vadd.f32 1.0, %v2246_v10  ;;  %v2248_v14 = vpop.eup %2247 }
 0x133   : > { %v1241_v17 = vmul.f32 %v2248_v14, %v1239_v3  ;;  %vm1246_vm1 = vweird.f32 %v2248_v14 }
 0x134   : > { %2249 = vrcp.f32 %v1258_v12  ;;  %vm1264_vm2 = vweird.f32 %v1258_v12  ;;  %v1270_v33 = vand.u32 2147483648, %v1258_v12  ;;  %vm2853_vm4 = vmor %vm1245_vm0, %vm1246_vm1  ;;  %v1268_v40 = vand.u32 2147483647, %v1258_v12 }
 0x135   : > { %v1182_v15 = vpop.f32.mrf.mxu3  ;;  %v1242_v21 = vsub.f32 1.0, %v1241_v17 }
 0x136   : > { %v1169_v13 = vpop.f32.mrf.mxu2  ;;  %v1271_v44 = vor.u32 1.1754944e-38, %v1270_v33  ;;  %vm1269_vm7 = vcmp.eq.f32.partialorder %v1268_v40, 8.507059e+37  ;;  %v2242_v15 = vld [vmem:[%s2920_s7] ss:$0 sm:$0xff] }
 0x137   : > { %v1243_v27 = vmul.f32 %v2248_v14, %v1242_v21 }
 0x139   : > { %v1244_v37 = vadd.f32 %v2248_v14, %v1243_v27 }
 0x13a   : > { %v2250_v20 = vpop.eup %2249 }
 0x13b   : > { %v1260_v22 = vmul.f32 %v2250_v20, %v1258_v12  ;;  %vm1265_vm3 = vweird.f32 %v2250_v20  ;;  %v1248_v46 = vsel %vm2853_vm4, %v2248_v14, %v1244_v37 }
 0x13c   : > { %vm1266_vm5 = vmor %vm1264_vm2, %vm1265_vm3  ;;  %v1253_v55 = vsel %vm1250_vm6, %v1252_v45, %v1248_v46 }
 0x13d   : > { %v1261_v24 = vsub.f32 1.0, %v1260_v22 }
 0x13f   : > { %v1262_v26 = vmul.f32 %v2250_v20, %v1261_v24 }
 0x141   : > { %v1263_v30 = vadd.f32 %v2250_v20, %v1262_v26 }
 0x143   : > { %v1267_v42 = vsel %vm1266_vm5, %v2250_v20, %v1263_v30 }
 0x144   : > { %v1193_v29 = vpop.f32.mrf.mxu0  ;;  %v1272_v48 = vsel %vm1269_vm7, %v1271_v44, %v1267_v42 }
 0x145   : > { %v1194_v34 = vadd.f32 %v1193_v29, %v1181_v28  ;;  %v1206_v36 = vpop.f32.mrf.mxu1  ;;  %v1295_v56 = vmul.f32 %v1294_v49, %v1272_v48 }
 0x146   : > { %v1207_v43 = vadd.f32 %v1206_v36, %v595_v31 }
 0x147   : > { %2251 = vtanh.f32 %v1194_v34 }
 0x14b   : > { %v1232_v52 = vpop.f32.mrf.mxu3 }
 0x14c   : > { %v1219_v50 = vpop.f32.mrf.mxu2  ;;  %v1195_v53 = vpop.f32.mrf.mxu0 }
 0x14d   : > { %v1220_v51 = vadd.f32 %v1219_v50, %v1207_v43  ;;  %v2252_v54 = vpop.eup %2251  ;;  %v1208_v58 = vpop.f32.mrf.mxu1 }
 0x14e   : > { %v1296_v7 = vmul.f32 %v2252_v54, %v1253_v55 }
 0x14f   : > { %v1233_v57 = vadd.f32 %v1232_v52, %v1220_v51 }
 0x150   : > { %v1297_v59 = vadd.f32 %v1296_v7, %v1295_v56 }
 0x151   : > { %v1987_v60 = vmul.f32 -1.442695, %v1233_v57 }
 0x152   : > { %1301 = vst [vmem:[#allocation4] sm:$0xff] %v1297_v59 }
 0x153   : > { %1386 = vst [vmem:[#allocation19] sm:$0xff] %v1297_v59  ;;  %2253 = vpow2.f32 %v1987_v60  ;;  %v1234_v62 = vpop.f32.mrf.mxu3 }
 0x154   : > { %v1221_v61 = vpop.f32.mrf.mxu2 }
 0x159   : > { %v2254_v63 = vpop.eup %2253 }
 0x15a   : > { %v1278_v0 = vadd.f32 1.0, %v2254_v63 }
 0x15c   : > { %2255 = vrcp.f32 %v1278_v0  ;;  %v1290_v4 = vand.u32 2147483648, %v1278_v0  ;;  %v1288_v6 = vand.u32 2147483647, %v1278_v0  ;;  %vm1284_vm9 = vweird.f32 %v1278_v0 }
 0x15d   : > { %2257 = vtanh.f32 %v1297_v59 }
 0x15e   : > { %v1291_v9 = vor.u32 1.1754944e-38, %v1290_v4  ;;  %vm1289_vm11 = vcmp.eq.f32.partialorder %v1288_v6, 8.507059e+37 }
 0x162   : > { %v2256_v1 = vpop.eup %2255 }
 0x163   : > { %v1280_v2 = vmul.f32 %v2256_v1, %v1278_v0  ;;  %vm1285_vm8 = vweird.f32 %v2256_v1  ;;  %v2258_v11 = vpop.eup %2257 }
 0x164   : > { %vm1286_vm10 = vmor %vm1284_vm9, %vm1285_vm8 }
 0x165   : > { %v1281_v3 = vsub.f32 1.0, %v1280_v2 }
 0x167   : > { %v1282_v5 = vmul.f32 %v2256_v1, %v1281_v3 }
 0x169   : > { %v1283_v8 = vadd.f32 %v2256_v1, %v1282_v5 }
 0x16b   : > { %v1287_v10 = vsel %vm1286_vm10, %v2256_v1, %v1283_v8 }
 0x16c   : > { %v1292_v12 = vsel %vm1289_vm11, %v1291_v9, %v1287_v10 }
 0x16d   : > { %v1299_v13 = vmul.f32 %v2258_v11, %v1292_v12 }
 0x16f   : > { %1300 = vst [vmem:[#allocation3] sm:$0xff] %v1299_v13  ;;  %v1302_v14 = vpack.c.bf16 %v1299_v13, %v1299_v13 }
 0x170   : > { %1385 = vst [vmem:[#allocation17] sm:$0xff] %v1299_v13 }
 0x171   : > { %1379 = vmatmul.bf16.vlgmr.msrb.gmra.mxu0 %v1302_v14  ;;  %2154 = dma.vmem_to_hbm [thread:$0]  (%p2953_p1), %s1413_s22, 128, %s1415_s23, [#allocation18]  }
 0x172   : > { %2156 = dma.vmem_to_hbm [thread:$0]  (%p2954_p12), %s1425_s29, 128, %s1427_s2, [#allocation18]  }
 0x173   : > { %s2509_s23 = sshra.s32 %s1403_s6, 4  ;;  %s2515_s29 = scalar_lea.hbm %s2921_s8, 64  ;;  %s2510_s23 = int_to_ptr.hbm [resolvable:$true] %s2509_s23 }
 0x174   : > { %s2511_s24 = scalar_lea.hbm %s2510_s23, 8  ;;  %p2516_p10 = scmp.lt.s32.totalorder %s2510_s23, %s2921_s8 }
 0x175   : > { %p2512_p7 = scmp.ne.s32.totalorder %s2510_s23, %s2511_s24  ;;  %p2517_p13 = scmp.lt.s32.totalorder %s2515_s29, %s2511_s24 }
 0x177   : > { %p2513_p9 = pnand %p2512_p7, %p2737_p5  ;;  %p2518_p3 = por %p2517_p13, %p2516_p10 }
 0x179   : > { %p2514_p8 = pneg %p2513_p9 }
 0x17b   : > { %p2519_p11 = pnand %p2518_p3, %p2514_p8 }
 0x1ee   : > { %v1380_v16 = vpop.f32.mrf.mxu0 }
 0x1ef   : > { %v1381_v17 = vadd.f32 %v2242_v15, %v1380_v16 }
 0x1f1   : > { %1384 = vst [vmem:[%s469_s27] sm:$0xff] %v1381_v17 }
 0x1f2   : > { %2522 = shalt.err (!%p2519_p11)
}
 0x1f3   : > { %2152 = dma.vmem_to_hbm [thread:$0]  (%p2737_p5), %s1401_s12, 128, %s1403_s6, %s1388_s25  }
 0x1f4   : > { %p2955_p0 = pmov %p2953_p1 }
 0x1f6   : > { %v1382_v18 = vpop.f32.mrf.mxu0 }
 0x1f7   : > { %2560 = dma.done.wait (%p2955_p0), [#allocation18], 256   ;;  %p2956_p2 = pmov %p2955_p0 }
 0x1f9   : > { %2562 = vsyncadd (%p2956_p2), [#allocation18], 4294967040 }
 0x1fa PF: > { %s2957_s15 = sld [smem:[#allocation27_spill]]  ;;  %p2199_p4 = scmp.ge.s32.totalorder %s2581_s16, 2 }
 0x1fc   : > { %p2183_p1 = pnand %p2199_p4, %p2741_p6 }
 0x1fe   : > { %p2184_p12 = pneg %p2183_p1 }
 0x200   : > { %s1448_s27 = sand.u32 1, %s2957_s15  }
 0x201   : > { %s1449_s2 = scalar_lea.sflag [#allocation7], %s1448_s27 }
 0x202   : > { %2564 = dma.done.wait (%p2184_p12), %s1449_s2, 128  }
 0x203   : > { %2566 = vsyncadd (%p2184_p12), %s1449_s2, 4294967168  ;;  %s2959_s16 = sld [smem:[#allocation29_spill]]  ;;  %s2962_s13 = smov %s2573_s14 }
 0x204   : > { %s2960_s28 = sld [smem:[#allocation28_spill]] }
 0x205   : > { %s2961_s15 = sld [smem:[#allocation30_spill]] }
 0x209   : > { %p30_p5 = scmp.ge.s32.totalorder %s2959_s16, 10  }
 0x20a   : > { %s2963_s14 = smov %s2960_s28 }
 0x20b   :  { %32 = sbr.rel (!%p30_p5) target bundleno = 15 (0xf), region = 146 }
 0x210   :  { %1455 = vsyncpa [#allocation6], 1 }
 0x211   :  { %1457 = vsyncpa [#allocation6 + $0x1], 1 }
 0x212   :  { %1458 = vsyncpa [#allocation9], 1 }
 0x213   :  { %1460 = vsyncpa [#allocation9 + $0x1], 1 }
 0x214   :  { %1461 = vsyncpa [#allocation12], 1 }
 0x215   :  { %1462 = vsyncpa [#allocation15], 1 }
 0x216   :  { %1463 = vsyncpa [#allocation7], 1 }
 0x217   :  { %1465 = vsyncpa [#allocation7 + $0x1], 1 }
 0x218   :  { %1466 = vsyncpa [#allocation18], 1 }

</bundles_post_ra>
